<compile_context>
chip_gen: v7x
topology: tpu7x:2x2x1
jax: 0.10.0
libtpu: 0.0.40
codegen_flags: <defaults>
</compile_context>

<pallas_src>
import functools

import jax
import jax.numpy as jnp
import numpy as np
from jax.experimental import pallas as pl
from jax.experimental.pallas import tpu as pltpu

LANE = 128
SUB = 8


def _round_up(x, m):
    return ((x + m - 1) // m) * m


def _answer_decoder_kernel(x_ref, h0_ref, c0_ref, w_ihb_ref, w_hh_ref,
                           w_lin_ref, b_lin_ref,
                           out_ref, hT_ref, cT_ref,
                           xg_ref, hhist_ref, h_car, c_car,
                           *, T, Tc, Bp, Hp, unroll):
    chunk = pl.program_id(0)
    n_chunks = pl.num_programs(0)

    # Initialize the persistent recurrent carry from (h0, c0) on the first
    # chunk; later chunks read the values left by the previous grid step.
    @pl.when(chunk == 0)
    def _():
        h_car[...] = h0_ref[...].astype(jnp.float32)
        c_car[...] = c0_ref[...].astype(jnp.float32)

    # --- Phase 1: input projection for the whole chunk as one MXU matmul.
    # The combined LSTM bias rides in the last row of w_ihb (ones column on X),
    # so there is no extra broadcast-add pass over the (Tc*Bp, 4Hp) slab. ---
    xg_ref[...] = jnp.dot(x_ref[...].astype(jnp.float32), w_ihb_ref[...],
                          preferred_element_type=jnp.float32
                          ).astype(xg_ref.dtype)

    # --- Phase 2: serial recurrence — only h @ W_hh^T plus elementwise gate
    # math on the critical path; h/c carried in registers inside the loop. ---
    w_hh = w_hh_ref[...]
    t_base = chunk * Tc

    def step(t, carry):
        h, c = carry
        row = pl.multiple_of(t * Bp, Bp)                  # Bp is a multiple of 8
        gates = (xg_ref[pl.ds(row, Bp), :].astype(jnp.float32)
                 + jnp.dot(h, w_hh, preferred_element_type=jnp.float32))
        # Gate columns reordered wrapper-side to [i, f, o | g]: one contiguous
        # lane-aligned sigmoid slice and one tanh slice.
        sig = jax.nn.sigmoid(gates[:, :3 * Hp])
        g_g = jnp.tanh(gates[:, 3 * Hp:])
        i_g = sig[:, 0 * Hp:1 * Hp]
        f_g = sig[:, 1 * Hp:2 * Hp]
        o_g = sig[:, 2 * Hp:3 * Hp]
        c_new = f_g * c + i_g * g_g
        h_new = o_g * jnp.tanh(c_new)
        # Mask padded timesteps (only when T % Tc != 0) so the final carry is
        # exact; their hhist/out rows are discarded in the wrapper anyway.
        valid = (t_base + t) < T
        h_new = jnp.where(valid, h_new, h)
        c_new = jnp.where(valid, c_new, c)
        hhist_ref[pl.ds(row, Bp), :] = h_new.astype(hhist_ref.dtype)
        return (h_new, c_new)

    hT, cT = jax.lax.fori_loop(0, Tc, step, (h_car[...], c_car[...]),
                               unroll=unroll)
    h_car[...] = hT
    c_car[...] = cT

    # --- Phase 3: output projection for the whole chunk as one MXU matmul
    # with a lane-dense (Op = multiple of 128) contiguous writeback. ---
    out_ref[...] = (jnp.dot(hhist_ref[...], w_lin_ref[...],
                            preferred_element_type=jnp.float32)
                    + b_lin_ref[...]).astype(out_ref.dtype)

    @pl.when(chunk == n_chunks - 1)
    def _():
        hT_ref[...] = hT.astype(hT_ref.dtype)
        cT_ref[...] = cT.astype(cT_ref.dtype)


def answer_decoder_forward(X, h0, c0, params, *, chunk_size=None,
                           storage_dtype=jnp.float32,
                           vmem_budget_bytes=40 * 1024 * 1024):
    """X: (T, B, D); h0, c0: (1, B, H). Returns (linear_out, (hT, cT)).

    Dense-tensor (isPacked=False) path of AnswerDecoder.forward.
    """
    T, B, D = X.shape
    H = h0.shape[-1]
    O = params["b_lin"].shape[-1]

    Hp = _round_up(H, LANE)           # hidden dim padded to lane tile
    Bp = _round_up(B, SUB)            # batch padded to sublane tile
    Op = _round_up(O, LANE)           # lane-dense output slab
    Daug = D + 1                      # +1 ones column carries the fused bias

    def reorder_and_pad_gates(w, axis=0):
        # `w` has 4H along `axis` in PyTorch order [i, f, g, o]; reorder to
        # [i, f, o, g] and zero-pad each gate block H -> Hp.
        i, f, g, o = jnp.split(w, 4, axis=axis)
        pad = [(0, 0)] * w.ndim
        pad[axis] = (0, Hp - H)
        return jnp.concatenate([jnp.pad(blk, pad) for blk in (i, f, o, g)],
                               axis=axis)

    # --- One-time weight prep (plain XLA ops outside the kernel) ---
    w_ih_t = reorder_and_pad_gates(params["w_ih"], axis=0).T            # (D, 4Hp)
    b_comb = reorder_and_pad_gates(params["b_ih"] + params["b_hh"],
                                   axis=0).reshape(1, 4 * Hp)           # (1, 4Hp)
    w_ihb = jnp.concatenate([w_ih_t, b_comb], axis=0)                   # (Daug, 4Hp)
    w_hh_p = reorder_and_pad_gates(params["w_hh"], axis=0)              # (4Hp, H)
    w_hh_t = jnp.pad(w_hh_p, ((0, 0), (0, Hp - H))).T                   # (Hp, 4Hp)
    w_lin_t = jnp.pad(params["w_lin"],
                      ((0, Op - O), (0, Hp - H))).T                     # (Hp, Op)
    b_lin_p = jnp.pad(params["b_lin"], (0, Op - O)).reshape(1, Op)      # (1, Op)

    # --- VMEM accounting: pick the chunk size and the vmem limit from the
    # actual buffer sizes (budget default keeps us under v7x's 64 MiB/TC). ---
    def nbytes(shape, dtype=jnp.float32):
        return int(np.prod(shape)) * jnp.dtype(dtype).itemsize

    xbytes = jnp.dtype(X.dtype).itemsize
    sbytes = jnp.dtype(storage_dtype).itemsize
    weight_bytes = (nbytes((Daug, 4 * Hp)) + nbytes((Hp, 4 * Hp))
                    + nbytes((Hp, Op)) + nbytes((1, Op))
                    + 2 * nbytes((Bp, Hp)))                 # + h0/c0
    per_t_bytes = Bp * (2 * Daug * xbytes      # X chunk (double-buffered)
                        + 2 * Op * xbytes      # out chunk (double-buffered)
                        + 4 * Hp * sbytes      # xg scratch
                        + Hp * sbytes)         # h-history scratch
    if chunk_size is None:
        chunk_size = max(1, (vmem_budget_bytes - weight_bytes) // per_t_bytes)
    Tc = int(min(chunk_size, T))
    n_chunks = int(pl.cdiv(T, Tc))
    Tp = n_chunks * Tc
    unroll = True if Tc <= 16 else 8           # bounded unroll for long chunks

    weight_bufs = 1 if n_chunks > 1 else 2
    resident = (weight_bytes * weight_bufs
                + Tc * per_t_bytes
                + 2 * nbytes((Bp, Hp))                     # f32 h/c carry
                + 2 * 2 * nbytes((Bp, Hp), X.dtype))       # hT/cT outputs
    vmem_limit = int(min(max(2 * resident + (4 << 20), 16 << 20), 56 << 20))

    # --- Input prep: pad time/batch, append the ones column, flatten (T,B)
    # into rows so every matmul is a single well-shaped (M, K) x (K, N). ---
    Xp = jnp.pad(X, ((0, Tp - T), (0, Bp - B), (0, 0)))
    Xa = jnp.concatenate([Xp, jnp.ones((Tp, Bp, 1), X.dtype)], axis=-1)
    Xa = Xa.reshape(Tp * Bp, Daug)
    h0p = jnp.pad(h0[0], ((0, Bp - B), (0, Hp - H)))
    c0p = jnp.pad(c0[0], ((0, Bp - B), (0, Hp - H)))

    const2 = lambda i: (0, 0)
    weight_mode = {}
    if n_chunks > 1:
        # Constant index_map -> double buffering only doubles the weights'
        # VMEM footprint; single-buffer them and spend the VMEM on chunk size.
        weight_mode = dict(pipeline_mode=pl.Buffered(1))

    in_specs = [
        pl.BlockSpec((Tc * Bp, Daug), lambda i: (i, 0)),            # X chunk
        pl.BlockSpec((Bp, Hp), const2),                             # h0
        pl.BlockSpec((Bp, Hp), const2),                             # c0
        # TODO(synk): on v5e, deeper input buffering (pl.Buffered(3) on the X
        # chunk) helps hide DMA under the cheaper MXU; VMEM headroom allows it.
        pl.BlockSpec((Daug, 4 * Hp), const2, **weight_mode),        # [W_ih^T; b]
        pl.BlockSpec((Hp, 4 * Hp), const2, **weight_mode),          # W_hh^T
        pl.BlockSpec((Hp, Op), const2, **weight_mode),              # W_lin^T
        pl.BlockSpec((1, Op), const2, **weight_mode),               # b_lin
    ]
    out_specs = [
        pl.BlockSpec((Tc * Bp, Op), lambda i: (i, 0)),              # out chunk
        pl.BlockSpec((Bp, Hp), const2),                             # h_T
        pl.BlockSpec((Bp, Hp), const2),                             # c_T
    ]
    scratch_shapes = [
        pltpu.VMEM((Tc * Bp, 4 * Hp), storage_dtype),   # per-chunk x-gates
        pltpu.VMEM((Tc * Bp, Hp), storage_dtype),       # per-chunk h history
        pltpu.VMEM((Bp, Hp), jnp.float32),              # h carry (persistent)
        pltpu.VMEM((Bp, Hp), jnp.float32),              # c carry (persistent)
    ]

    kernel = functools.partial(_answer_decoder_kernel,
                               T=T, Tc=Tc, Bp=Bp, Hp=Hp, unroll=unroll)

    out2, hTp, cTp = pl.pallas_call(
        kernel,
        grid_spec=pltpu.PrefetchScalarGridSpec(
            num_scalar_prefetch=0,
            grid=(n_chunks,),
            in_specs=in_specs,
            out_specs=out_specs,
            scratch_shapes=scratch_shapes),
        out_shape=(
            jax.ShapeDtypeStruct((Tp * Bp, Op), X.dtype),
            jax.ShapeDtypeStruct((Bp, Hp), X.dtype),
            jax.ShapeDtypeStruct((Bp, Hp), X.dtype),
        ),
        compiler_params=pltpu.CompilerParams(
            # The time-chunk axis carries the recurrence -> strictly serial.
            dimension_semantics=("arbitrary",),
            vmem_limit_bytes=vmem_limit,
        ),
    )(Xa, h0p, c0p, w_ihb, w_hh_t, w_lin_t, b_lin_p)

    # Un-pad / un-flatten outside the kernel (cheap XLA ops).
    out = out2.reshape(Tp, Bp, Op)[:T, :B, :O]
    hT = hTp[:B, :H][None]
    cT = cTp[:B, :H][None]
    return out, (hT, cT)


def _reference_forward(X, h0, c0, params):
    """Pure-JAX reference matching PyTorch nn.LSTM + nn.Linear semantics."""
    H = h0.shape[-1]

    def step(carry, x_t):
        h, c = carry
        gates = (x_t @ params["w_ih"].T + params["b_ih"]
                 + h @ params["w_hh"].T + params["b_hh"])
        i = jax.nn.sigmoid(gates[:, 0 * H:1 * H])
        f = jax.nn.sigmoid(gates[:, 1 * H:2 * H])
        g = jnp.tanh(gates[:, 2 * H:3 * H])
        o = jax.nn.sigmoid(gates[:, 3 * H:4 * H])
        c_new = f * c + i * g
        h_new = o * jnp.tanh(c_new)
        return (h_new, c_new), h_new

    (hT, cT), hs = jax.lax.scan(step, (h0[0], c0[0]), X)
    lin = hs @ params["w_lin"].T + params["b_lin"]
    return lin, (hT[None], cT[None])


def init_params(key, input_dim, hidden_dim, output_dim):
    """Same shapes / uniform(-1/sqrt(H), 1/sqrt(H)) init as PyTorch."""
    k = 1.0 / np.sqrt(hidden_dim)
    ks = jax.random.split(key, 6)
    u = lambda kk, shape: jax.random.uniform(kk, shape, jnp.float32, -k, k)
    return {
        "w_ih": u(ks[0], (4 * hidden_dim, input_dim)),
        "w_hh": u(ks[1], (4 * hidden_dim, hidden_dim)),
        "b_ih": u(ks[2], (4 * hidden_dim,)),
        "b_hh": u(ks[3], (4 * hidden_dim,)),
        "w_lin": u(ks[4], (output_dim, hidden_dim)),
        "b_lin": u(ks[5], (output_dim,)),
    }


if __name__ == "__main__":
    T, B = 8, 4
    input_dim, hidden_dim, output_dim = 16, 32, 8

    key = jax.random.PRNGKey(0)
    k_p, k_x = jax.random.split(key, 2)

    params = init_params(k_p, input_dim, hidden_dim, output_dim)
    X = jax.random.normal(k_x, (T, B, input_dim), jnp.float32)
    # initHidden(batch_size) zeros; use zeros for (h0, c0) like the module.
    h0 = jnp.zeros((1, B, hidden_dim), jnp.float32)
    c0 = jnp.zeros((1, B, hidden_dim), jnp.float32)

    # chunk_size=4 -> 2 grid steps: exercises the time-chunked pipeline, the
    # persistent h/c carry across grid steps and single-buffered weights.
    out, (hT, cT) = answer_decoder_forward(X, h0, c0, params, chunk_size=4)
    jax.block_until_ready((out, hT, cT))

    ref_out, (ref_hT, ref_cT) = _reference_forward(X, h0, c0, params)
    np.testing.assert_allclose(np.asarray(out), np.asarray(ref_out),
                               rtol=1e-4, atol=1e-4)
    np.testing.assert_allclose(np.asarray(hT), np.asarray(ref_hT),
                               rtol=1e-4, atol=1e-4)
    np.testing.assert_allclose(np.asarray(cT), np.asarray(ref_cT),
                               rtol=1e-4, atol=1e-4)

    print("KERNEL_OK")
</pallas_src>

<mosaic_0001>
module attributes {stable_mosaic.version = 11 : i64} {
  func.func @_answer_decoder_kernel(%arg0: i32, %arg1: memref<32x17xf32, #tpu.memory_space<vmem>>, %arg2: memref<8x128xf32, #tpu.memory_space<vmem>>, %arg3: memref<8x128xf32, #tpu.memory_space<vmem>>, %arg4: memref<17x512xf32, #tpu.memory_space<vmem>>, %arg5: memref<128x512xf32, #tpu.memory_space<vmem>>, %arg6: memref<128x128xf32, #tpu.memory_space<vmem>>, %arg7: memref<1x128xf32, #tpu.memory_space<vmem>>, %arg8: memref<32x128xf32, #tpu.memory_space<vmem>>, %arg9: memref<8x128xf32, #tpu.memory_space<vmem>>, %arg10: memref<8x128xf32, #tpu.memory_space<vmem>>, %arg11: memref<32x512xf32, #tpu.memory_space<vmem>>, %arg12: memref<32x128xf32, #tpu.memory_space<vmem>>, %arg13: memref<8x128xf32, #tpu.memory_space<vmem>>, %arg14: memref<8x128xf32, #tpu.memory_space<vmem>>) attributes {dimension_semantics = [#tpu.dimension_semantics<arbitrary>], iteration_bounds = array<i64: 2>, scalar_prefetch = 0 : i64, scratch_operands = 4 : i64, tpu.core_type = #tpu.core_type<tc>, window_params = [{transform_indices = @transform_0, window_bounds = array<i64: 32, 17>}, {pipeline_mode = #tpu.pipeline_mode<synchronous>, transform_indices = @transform_1, window_bounds = array<i64: 8, 128>}, {pipeline_mode = #tpu.pipeline_mode<synchronous>, transform_indices = @transform_2, window_bounds = array<i64: 8, 128>}, {pipeline_mode = #tpu.pipeline_mode<synchronous>, transform_indices = @transform_3, window_bounds = array<i64: 17, 512>}, {pipeline_mode = #tpu.pipeline_mode<synchronous>, transform_indices = @transform_4, window_bounds = array<i64: 128, 512>}, {pipeline_mode = #tpu.pipeline_mode<synchronous>, transform_indices = @transform_5, window_bounds = array<i64: 128, 128>}, {pipeline_mode = #tpu.pipeline_mode<synchronous>, transform_indices = @transform_6, window_bounds = array<i64: 1, 128>}, {transform_indices = @transform_7, window_bounds = array<i64: 32, 128>}, {pipeline_mode = #tpu.pipeline_mode<synchronous>, transform_indices = @transform_8, window_bounds = array<i64: 8, 128>}, {pipeline_mode = #tpu.pipeline_mode<synchronous>, transform_indices = @transform_9, window_bounds = array<i64: 8, 128>}]} {
    %c0_i32 = arith.constant 0 : i32
    %0 = arith.cmpi eq, %arg0, %c0_i32 : i32
    %1 = arith.extui %0 : i1 to i32
    %c0_i32_0 = arith.constant 0 : i32
    %2 = arith.cmpi ne, %1, %c0_i32_0 : i32
    scf.if %2 {
      %c0_52 = arith.constant 0 : index
      %c0_53 = arith.constant 0 : index
      %135 = vector.load %arg2[%c0_52, %c0_53] : memref<8x128xf32, #tpu.memory_space<vmem>>, vector<8x128xf32>
      %c0_54 = arith.constant 0 : index
      %c0_55 = arith.constant 0 : index
      %136 = vector.load %arg13[%c0_54, %c0_55] : memref<8x128xf32, #tpu.memory_space<vmem>>, vector<8x128xf32>
      tpu.vector_store %arg13[%c0_54, %c0_55], %135 {strides = array<i32>} : memref<8x128xf32, #tpu.memory_space<vmem>>, vector<8x128xf32>,
      %c0_56 = arith.constant 0 : index
      %c0_57 = arith.constant 0 : index
      %137 = vector.load %arg3[%c0_56, %c0_57] : memref<8x128xf32, #tpu.memory_space<vmem>>, vector<8x128xf32>
      %c0_58 = arith.constant 0 : index
      %c0_59 = arith.constant 0 : index
      %138 = vector.load %arg14[%c0_58, %c0_59] : memref<8x128xf32, #tpu.memory_space<vmem>>, vector<8x128xf32>
      tpu.vector_store %arg14[%c0_58, %c0_59], %137 {strides = array<i32>} : memref<8x128xf32, #tpu.memory_space<vmem>>, vector<8x128xf32>,
    } else {
    }
    %c0 = arith.constant 0 : index
    %c0_1 = arith.constant 0 : index
    %3 = vector.load %arg1[%c0, %c0_1] : memref<32x17xf32, #tpu.memory_space<vmem>>, vector<32x17xf32>
    %c0_2 = arith.constant 0 : index
    %c0_3 = arith.constant 0 : index
    %4 = vector.load %arg4[%c0_2, %c0_3] : memref<17x512xf32, #tpu.memory_space<vmem>>, vector<17x512xf32>
    %cst = arith.constant dense<0.000000e+00> : vector<32x512xf32>
    %5 = tpu.matmul %3, %4, %cst {dimension_numbers = #tpu.dot_dimension_numbers<[1], [0], [0], [1], [0, 0, 1, 1], [], []>} : vector<32x17xf32>, vector<17x512xf32>, vector<32x512xf32> -> vector<32x512xf32>
    %c0_4 = arith.constant 0 : index
    %c0_5 = arith.constant 0 : index
    %6 = vector.load %arg11[%c0_4, %c0_5] : memref<32x512xf32, #tpu.memory_space<vmem>>, vector<32x512xf32>
    tpu.vector_store %arg11[%c0_4, %c0_5], %5 {strides = array<i32>} : memref<32x512xf32, #tpu.memory_space<vmem>>, vector<32x512xf32>,
    %c0_6 = arith.constant 0 : index
    %c0_7 = arith.constant 0 : index
    %7 = vector.load %arg5[%c0_6, %c0_7] : memref<128x512xf32, #tpu.memory_space<vmem>>, vector<128x512xf32>
    %c4_i32 = arith.constant 4 : i32
    %8 = arith.muli %arg0, %c4_i32 : i32
    %c0_8 = arith.constant 0 : index
    %c0_9 = arith.constant 0 : index
    %9 = vector.load %arg13[%c0_8, %c0_9] : memref<8x128xf32, #tpu.memory_space<vmem>>, vector<8x128xf32>
    %c0_10 = arith.constant 0 : index
    %c0_11 = arith.constant 0 : index
    %10 = vector.load %arg14[%c0_10, %c0_11] : memref<8x128xf32, #tpu.memory_space<vmem>>, vector<8x128xf32>
    %c0_i32_12 = arith.constant 0 : i32
    %c8_i32 = arith.constant 8 : i32
    %11 = arith.muli %c0_i32_12, %c8_i32 : i32
    %12 = tpu.assume_multiple %11, 8 : i32
    %13 = arith.index_cast %12 : i32 to index
    %c0_13 = arith.constant 0 : index
    %14 = vector.load %arg11[%13, %c0_13] : memref<32x512xf32, #tpu.memory_space<vmem>>, vector<8x512xf32>
    %cst_14 = arith.constant dense<0.000000e+00> : vector<8x512xf32>
    %15 = tpu.matmul %9, %7, %cst_14 {dimension_numbers = #tpu.dot_dimension_numbers<[1], [0], [0], [1], [0, 0, 1, 1], [], []>} : vector<8x128xf32>, vector<128x512xf32>, vector<8x512xf32> -> vector<8x512xf32>
    %16 = arith.addf %14, %15 : vector<8x512xf32>
    %17 = vector.extract_strided_slice %16 {offsets = [0, 0], sizes = [8, 384], strides = [1, 1]} : vector<8x512xf32> to vector<8x384xf32>
    %18 = arith.negf %17 : vector<8x384xf32>
    %19 = math.exp %18 : vector<8x384xf32>
    %cst_15 = arith.constant 1.000000e+00 : f32
    %20 = vector.broadcast %cst_15 : f32 to vector<8x384xf32>
    %21 = arith.addf %20, %19 : vector<8x384xf32>
    %22 = arith.divf %20, %21 : vector<8x384xf32>
    %23 = vector.extract_strided_slice %16 {offsets = [0, 384], sizes = [8, 128], strides = [1, 1]} : vector<8x512xf32> to vector<8x128xf32>
    %24 = math.tanh %23 : vector<8x128xf32>
    %25 = vector.extract_strided_slice %22 {offsets = [0, 0], sizes = [8, 128], strides = [1, 1]} : vector<8x384xf32> to vector<8x128xf32>
    %26 = vector.extract_strided_slice %22 {offsets = [0, 128], sizes = [8, 128], strides = [1, 1]} : vector<8x384xf32> to vector<8x128xf32>
    %27 = vector.extract_strided_slice %22 {offsets = [0, 256], sizes = [8, 128], strides = [1, 1]} : vector<8x384xf32> to vector<8x128xf32>
    %28 = arith.mulf %26, %10 : vector<8x128xf32>
    %29 = arith.mulf %25, %24 : vector<8x128xf32>
    %30 = arith.addf %28, %29 : vector<8x128xf32>
    %31 = math.tanh %30 : vector<8x128xf32>
    %32 = arith.mulf %27, %31 : vector<8x128xf32>
    %33 = arith.addi %8, %c0_i32_12 : i32
    %c8_i32_16 = arith.constant 8 : i32
    %34 = arith.cmpi slt, %33, %c8_i32_16 : i32
    %35 = arith.select %34, %32, %9 : vector<8x128xf32>
    %36 = arith.select %34, %30, %10 : vector<8x128xf32>
    %37 = arith.index_cast %12 : i32 to index
    %c0_17 = arith.constant 0 : index
    %38 = vector.load %arg12[%37, %c0_17] : memref<32x128xf32, #tpu.memory_space<vmem>>, vector<8x128xf32>
    tpu.vector_store %arg12[%37, %c0_17], %35 {strides = array<i32>} : memref<32x128xf32, #tpu.memory_space<vmem>>, vector<8x128xf32>,
    %c1_i32 = arith.constant 1 : i32
    %c8_i32_18 = arith.constant 8 : i32
    %39 = arith.muli %c1_i32, %c8_i32_18 : i32
    %40 = tpu.assume_multiple %39, 8 : i32
    %41 = arith.index_cast %40 : i32 to index
    %c0_19 = arith.constant 0 : index
    %42 = vector.load %arg11[%41, %c0_19] : memref<32x512xf32, #tpu.memory_space<vmem>>, vector<8x512xf32>
    %cst_20 = arith.constant dense<0.000000e+00> : vector<8x512xf32>
    %43 = tpu.matmul %35, %7, %cst_20 {dimension_numbers = #tpu.dot_dimension_numbers<[1], [0], [0], [1], [0, 0, 1, 1], [], []>} : vector<8x128xf32>, vector<128x512xf32>, vector<8x512xf32> -> vector<8x512xf32>
    %44 = arith.addf %42, %43 : vector<8x512xf32>
    %45 = vector.extract_strided_slice %44 {offsets = [0, 0], sizes = [8, 384], strides = [1, 1]} : vector<8x512xf32> to vector<8x384xf32>
    %46 = arith.negf %45 : vector<8x384xf32>
    %47 = math.exp %46 : vector<8x384xf32>
    %cst_21 = arith.constant 1.000000e+00 : f32
    %48 = vector.broadcast %cst_21 : f32 to vector<8x384xf32>
    %49 = arith.addf %48, %47 : vector<8x384xf32>
    %50 = arith.divf %48, %49 : vector<8x384xf32>
    %51 = vector.extract_strided_slice %44 {offsets = [0, 384], sizes = [8, 128], strides = [1, 1]} : vector<8x512xf32> to vector<8x128xf32>
    %52 = math.tanh %51 : vector<8x128xf32>
    %53 = vector.extract_strided_slice %50 {offsets = [0, 0], sizes = [8, 128], strides = [1, 1]} : vector<8x384xf32> to vector<8x128xf32>
    %54 = vector.extract_strided_slice %50 {offsets = [0, 128], sizes = [8, 128], strides = [1, 1]} : vector<8x384xf32> to vector<8x128xf32>
    %55 = vector.extract_strided_slice %50 {offsets = [0, 256], sizes = [8, 128], strides = [1, 1]} : vector<8x384xf32> to vector<8x128xf32>
    %56 = arith.mulf %54, %36 : vector<8x128xf32>
    %57 = arith.mulf %53, %52 : vector<8x128xf32>
    %58 = arith.addf %56, %57 : vector<8x128xf32>
    %59 = math.tanh %58 : vector<8x128xf32>
    %60 = arith.mulf %55, %59 : vector<8x128xf32>
    %61 = arith.addi %8, %c1_i32 : i32
    %c8_i32_22 = arith.constant 8 : i32
    %62 = arith.cmpi slt, %61, %c8_i32_22 : i32
    %63 = arith.select %62, %60, %35 : vector<8x128xf32>
    %64 = arith.select %62, %58, %36 : vector<8x128xf32>
    %65 = arith.index_cast %40 : i32 to index
    %c0_23 = arith.constant 0 : index
    %66 = vector.load %arg12[%65, %c0_23] : memref<32x128xf32, #tpu.memory_space<vmem>>, vector<8x128xf32>
    tpu.vector_store %arg12[%65, %c0_23], %63 {strides = array<i32>} : memref<32x128xf32, #tpu.memory_space<vmem>>, vector<8x128xf32>,
    %c2_i32 = arith.constant 2 : i32
    %c8_i32_24 = arith.constant 8 : i32
    %67 = arith.muli %c2_i32, %c8_i32_24 : i32
    %68 = tpu.assume_multiple %67, 8 : i32
    %69 = arith.index_cast %68 : i32 to index
    %c0_25 = arith.constant 0 : index
    %70 = vector.load %arg11[%69, %c0_25] : memref<32x512xf32, #tpu.memory_space<vmem>>, vector<8x512xf32>
    %cst_26 = arith.constant dense<0.000000e+00> : vector<8x512xf32>
    %71 = tpu.matmul %63, %7, %cst_26 {dimension_numbers = #tpu.dot_dimension_numbers<[1], [0], [0], [1], [0, 0, 1, 1], [], []>} : vector<8x128xf32>, vector<128x512xf32>, vector<8x512xf32> -> vector<8x512xf32>
    %72 = arith.addf %70, %71 : vector<8x512xf32>
    %73 = vector.extract_strided_slice %72 {offsets = [0, 0], sizes = [8, 384], strides = [1, 1]} : vector<8x512xf32> to vector<8x384xf32>
    %74 = arith.negf %73 : vector<8x384xf32>
    %75 = math.exp %74 : vector<8x384xf32>
    %cst_27 = arith.constant 1.000000e+00 : f32
    %76 = vector.broadcast %cst_27 : f32 to vector<8x384xf32>
    %77 = arith.addf %76, %75 : vector<8x384xf32>
    %78 = arith.divf %76, %77 : vector<8x384xf32>
    %79 = vector.extract_strided_slice %72 {offsets = [0, 384], sizes = [8, 128], strides = [1, 1]} : vector<8x512xf32> to vector<8x128xf32>
    %80 = math.tanh %79 : vector<8x128xf32>
    %81 = vector.extract_strided_slice %78 {offsets = [0, 0], sizes = [8, 128], strides = [1, 1]} : vector<8x384xf32> to vector<8x128xf32>
    %82 = vector.extract_strided_slice %78 {offsets = [0, 128], sizes = [8, 128], strides = [1, 1]} : vector<8x384xf32> to vector<8x128xf32>
    %83 = vector.extract_strided_slice %78 {offsets = [0, 256], sizes = [8, 128], strides = [1, 1]} : vector<8x384xf32> to vector<8x128xf32>
    %84 = arith.mulf %82, %64 : vector<8x128xf32>
    %85 = arith.mulf %81, %80 : vector<8x128xf32>
    %86 = arith.addf %84, %85 : vector<8x128xf32>
    %87 = math.tanh %86 : vector<8x128xf32>
    %88 = arith.mulf %83, %87 : vector<8x128xf32>
    %89 = arith.addi %8, %c2_i32 : i32
    %c8_i32_28 = arith.constant 8 : i32
    %90 = arith.cmpi slt, %89, %c8_i32_28 : i32
    %91 = arith.select %90, %88, %63 : vector<8x128xf32>
    %92 = arith.select %90, %86, %64 : vector<8x128xf32>
    %93 = arith.index_cast %68 : i32 to index
    %c0_29 = arith.constant 0 : index
    %94 = vector.load %arg12[%93, %c0_29] : memref<32x128xf32, #tpu.memory_space<vmem>>, vector<8x128xf32>
    tpu.vector_store %arg12[%93, %c0_29], %91 {strides = array<i32>} : memref<32x128xf32, #tpu.memory_space<vmem>>, vector<8x128xf32>,
    %c3_i32 = arith.constant 3 : i32
    %c8_i32_30 = arith.constant 8 : i32
    %95 = arith.muli %c3_i32, %c8_i32_30 : i32
    %96 = tpu.assume_multiple %95, 8 : i32
    %97 = arith.index_cast %96 : i32 to index
    %c0_31 = arith.constant 0 : index
    %98 = vector.load %arg11[%97, %c0_31] : memref<32x512xf32, #tpu.memory_space<vmem>>, vector<8x512xf32>
    %cst_32 = arith.constant dense<0.000000e+00> : vector<8x512xf32>
    %99 = tpu.matmul %91, %7, %cst_32 {dimension_numbers = #tpu.dot_dimension_numbers<[1], [0], [0], [1], [0, 0, 1, 1], [], []>} : vector<8x128xf32>, vector<128x512xf32>, vector<8x512xf32> -> vector<8x512xf32>
    %100 = arith.addf %98, %99 : vector<8x512xf32>
    %101 = vector.extract_strided_slice %100 {offsets = [0, 0], sizes = [8, 384], strides = [1, 1]} : vector<8x512xf32> to vector<8x384xf32>
    %102 = arith.negf %101 : vector<8x384xf32>
    %103 = math.exp %102 : vector<8x384xf32>
    %cst_33 = arith.constant 1.000000e+00 : f32
    %104 = vector.broadcast %cst_33 : f32 to vector<8x384xf32>
    %105 = arith.addf %104, %103 : vector<8x384xf32>
    %106 = arith.divf %104, %105 : vector<8x384xf32>
    %107 = vector.extract_strided_slice %100 {offsets = [0, 384], sizes = [8, 128], strides = [1, 1]} : vector<8x512xf32> to vector<8x128xf32>
    %108 = math.tanh %107 : vector<8x128xf32>
    %109 = vector.extract_strided_slice %106 {offsets = [0, 0], sizes = [8, 128], strides = [1, 1]} : vector<8x384xf32> to vector<8x128xf32>
    %110 = vector.extract_strided_slice %106 {offsets = [0, 128], sizes = [8, 128], strides = [1, 1]} : vector<8x384xf32> to vector<8x128xf32>
    %111 = vector.extract_strided_slice %106 {offsets = [0, 256], sizes = [8, 128], strides = [1, 1]} : vector<8x384xf32> to vector<8x128xf32>
    %112 = arith.mulf %110, %92 : vector<8x128xf32>
    %113 = arith.mulf %109, %108 : vector<8x128xf32>
    %114 = arith.addf %112, %113 : vector<8x128xf32>
    %115 = math.tanh %114 : vector<8x128xf32>
    %116 = arith.mulf %111, %115 : vector<8x128xf32>
    %117 = arith.addi %8, %c3_i32 : i32
    %c8_i32_34 = arith.constant 8 : i32
    %118 = arith.cmpi slt, %117, %c8_i32_34 : i32
    %119 = arith.select %118, %116, %91 : vector<8x128xf32>
    %120 = arith.select %118, %114, %92 : vector<8x128xf32>
    %121 = arith.index_cast %96 : i32 to index
    %c0_35 = arith.constant 0 : index
    %122 = vector.load %arg12[%121, %c0_35] : memref<32x128xf32, #tpu.memory_space<vmem>>, vector<8x128xf32>
    tpu.vector_store %arg12[%121, %c0_35], %119 {strides = array<i32>} : memref<32x128xf32, #tpu.memory_space<vmem>>, vector<8x128xf32>,
    %c4_i32_36 = arith.constant 4 : i32
    %c0_37 = arith.constant 0 : index
    %c0_38 = arith.constant 0 : index
    %123 = vector.load %arg13[%c0_37, %c0_38] : memref<8x128xf32, #tpu.memory_space<vmem>>, vector<8x128xf32>
    tpu.vector_store %arg13[%c0_37, %c0_38], %119 {strides = array<i32>} : memref<8x128xf32, #tpu.memory_space<vmem>>, vector<8x128xf32>,
    %c0_39 = arith.constant 0 : index
    %c0_40 = arith.constant 0 : index
    %124 = vector.load %arg14[%c0_39, %c0_40] : memref<8x128xf32, #tpu.memory_space<vmem>>, vector<8x128xf32>
    tpu.vector_store %arg14[%c0_39, %c0_40], %120 {strides = array<i32>} : memref<8x128xf32, #tpu.memory_space<vmem>>, vector<8x128xf32>,
    %c0_41 = arith.constant 0 : index
    %c0_42 = arith.constant 0 : index
    %125 = vector.load %arg12[%c0_41, %c0_42] : memref<32x128xf32, #tpu.memory_space<vmem>>, vector<32x128xf32>
    %c0_43 = arith.constant 0 : index
    %c0_44 = arith.constant 0 : index
    %126 = vector.load %arg6[%c0_43, %c0_44] : memref<128x128xf32, #tpu.memory_space<vmem>>, vector<128x128xf32>
    %cst_45 = arith.constant dense<0.000000e+00> : vector<32x128xf32>
    %127 = tpu.matmul %125, %126, %cst_45 {dimension_numbers = #tpu.dot_dimension_numbers<[1], [0], [0], [1], [0, 0, 1, 1], [], []>} : vector<32x128xf32>, vector<128x128xf32>, vector<32x128xf32> -> vector<32x128xf32>
    %c0_46 = arith.constant 0 : index
    %c0_47 = arith.constant 0 : index
    %128 = vector.load %arg7[%c0_46, %c0_47] : memref<1x128xf32, #tpu.memory_space<vmem>>, vector<1x128xf32>
    %129 = vector.broadcast %128 : vector<1x128xf32> to vector<32x128xf32>
    %130 = arith.addf %127, %129 : vector<32x128xf32>
    %c0_48 = arith.constant 0 : index
    %c0_49 = arith.constant 0 : index
    %131 = vector.load %arg8[%c0_48, %c0_49] : memref<32x128xf32, #tpu.memory_space<vmem>>, vector<32x128xf32>
    tpu.vector_store %arg8[%c0_48, %c0_49], %130 {strides = array<i32>} : memref<32x128xf32, #tpu.memory_space<vmem>>, vector<32x128xf32>,
    %c1_i32_50 = arith.constant 1 : i32
    %132 = arith.cmpi eq, %arg0, %c1_i32_50 : i32
    %133 = arith.extui %132 : i1 to i32
    %c0_i32_51 = arith.constant 0 : i32
    %134 = arith.cmpi ne, %133, %c0_i32_51 : i32
    scf.if %134 {
      %c0_52 = arith.constant 0 : index
      %c0_53 = arith.constant 0 : index
      %135 = vector.load %arg9[%c0_52, %c0_53] : memref<8x128xf32, #tpu.memory_space<vmem>>, vector<8x128xf32>
      tpu.vector_store %arg9[%c0_52, %c0_53], %119 {strides = array<i32>} : memref<8x128xf32, #tpu.memory_space<vmem>>, vector<8x128xf32>,
      %c0_54 = arith.constant 0 : index
      %c0_55 = arith.constant 0 : index
      %136 = vector.load %arg10[%c0_54, %c0_55] : memref<8x128xf32, #tpu.memory_space<vmem>>, vector<8x128xf32>
      tpu.vector_store %arg10[%c0_54, %c0_55], %120 {strides = array<i32>} : memref<8x128xf32, #tpu.memory_space<vmem>>, vector<8x128xf32>,
    } else {
    }
    return
  }
  func.func @transform_0(%arg0: i32) -> (i32, i32) {
    %c0_i32 = arith.constant 0 : i32
    %c0_i32_0 = arith.constant 0 : i32
    return %arg0, %c0_i32 : i32, i32
  }
  func.func @transform_1(%arg0: i32) -> (i32, i32) {
    %c0_i32 = arith.constant 0 : i32
    %c0_i32_0 = arith.constant 0 : i32
    %c0_i32_1 = arith.constant 0 : i32
    return %c0_i32, %c0_i32_0 : i32, i32
  }
  func.func @transform_2(%arg0: i32) -> (i32, i32) {
    %c0_i32 = arith.constant 0 : i32
    %c0_i32_0 = arith.constant 0 : i32
    %c0_i32_1 = arith.constant 0 : i32
    return %c0_i32, %c0_i32_0 : i32, i32
  }
  func.func @transform_3(%arg0: i32) -> (i32, i32) {
    %c0_i32 = arith.constant 0 : i32
    %c0_i32_0 = arith.constant 0 : i32
    %c0_i32_1 = arith.constant 0 : i32
    return %c0_i32, %c0_i32_0 : i32, i32
  }
  func.func @transform_4(%arg0: i32) -> (i32, i32) {
    %c0_i32 = arith.constant 0 : i32
    %c0_i32_0 = arith.constant 0 : i32
    %c0_i32_1 = arith.constant 0 : i32
    return %c0_i32, %c0_i32_0 : i32, i32
  }
  func.func @transform_5(%arg0: i32) -> (i32, i32) {
    %c0_i32 = arith.constant 0 : i32
    %c0_i32_0 = arith.constant 0 : i32
    %c0_i32_1 = arith.constant 0 : i32
    return %c0_i32, %c0_i32_0 : i32, i32
  }
  func.func @transform_6(%arg0: i32) -> (i32, i32) {
    %c0_i32 = arith.constant 0 : i32
    %c0_i32_0 = arith.constant 0 : i32
    %c0_i32_1 = arith.constant 0 : i32
    return %c0_i32, %c0_i32_0 : i32, i32
  }
  func.func @transform_7(%arg0: i32) -> (i32, i32) {
    %c0_i32 = arith.constant 0 : i32
    %c0_i32_0 = arith.constant 0 : i32
    return %arg0, %c0_i32 : i32, i32
  }
  func.func @transform_8(%arg0: i32) -> (i32, i32) {
    %c0_i32 = arith.constant 0 : i32
    %c0_i32_0 = arith.constant 0 : i32
    %c0_i32_1 = arith.constant 0 : i32
    return %c0_i32, %c0_i32_0 : i32, i32
  }
  func.func @transform_9(%arg0: i32) -> (i32, i32) {
    %c0_i32 = arith.constant 0 : i32
    %c0_i32_0 = arith.constant 0 : i32
    %c0_i32_1 = arith.constant 0 : i32
    return %c0_i32, %c0_i32_0 : i32, i32
  }
}

</mosaic_0001>

<bundles_post_ra>
// kernel: tpu_custom_call.1
= control target key start
LH: loop header
LB: loop body
LE: loop exit
PB: predicated region body
PF: predicated region fallthrough
CT: control target
= control target key end

     0   :  { %s3241_s0 = inlined_call_operand.vmem [shape: f32[64,17], index: 0, kind: input, shape index: {}]   ;;  %s3242_s1 = inlined_call_operand.hbm [shape: f32[8,128], index: 1, kind: input, shape index: {}]   ;;  %s3243_s2 = inlined_call_operand.hbm [shape: f32[8,128], index: 2, kind: input, shape index: {}]   ;;  %s3244_s3 = inlined_call_operand.vmem [shape: f32[17,512], index: 3, kind: input, shape index: {}]   ;;  %s3245_s4 = inlined_call_operand.hbm [shape: f32[128,512], index: 4, kind: input, shape index: {}]   ;;  %s3246_s5 = inlined_call_operand.hbm [shape: f32[128,128], index: 5, kind: input, shape index: {}]   ;;  %s3247_s6 = inlined_call_operand.vmem [shape: f32[1,128], index: 6, kind: input, shape index: {}]   ;;  %s3248_s7 = inlined_call_operand.hbm [shape: f32[64,128], index: 7, kind: output, shape index: {0}]   ;;  %s3249_s8 = inlined_call_operand.hbm [shape: f32[8,128], index: 8, kind: output, shape index: {1}]   ;;  %s3250_s9 = inlined_call_operand.hbm [shape: f32[8,128], index: 9, kind: output, shape index: {2}]  }
   0x1   :  { %3258 = sst [smem:[#allocation26_spill]] %s3242_s1 }
   0x2   :  { %3259 = sst [smem:[#allocation27_spill]] %s3243_s2 }
   0x3   :  { %15 = vsyncpa [#allocation7], 0 }
   0x4   :  { %16 = vsyncpa [#allocation10], 0 }
   0x5   :  { %17 = vsyncpa [#allocation13], 0 }
   0x6   :  { %18 = vsyncpa [#allocation8], 0 }
   0x7   :  { %20 = vsyncpa [#allocation8 + $0x1], 0 }
   0x8   :  { %21 = vsyncpa [#allocation16], 0  ;;  %s2621_s30 = smov 0   ;;  %s2623_s10 = smov 0  }
   0x9   :  { %s2625_s11 = smov 0   ;;  %s2627_s12 = smov 0  }
   0xa LB: > { %3260 = sst [smem:[#allocation23_spill]] %s2551_s11  ;;  %s2642_s13 = sadd.s32 4294967295, %s2555_s12   ;;  %s2555_s12 = sphi %s2627_s12, %s3288_s12   ;;  %s2551_s11 = sphi %s2625_s11, %s3290_s11   ;;  %s2547_s10 = sphi %s2623_s10, %s3292_s10   ;;  %s2543_s30 = sphi %s2621_s30, %s3291_s30  }
   0xb   : > { %s1725_s14 = sadd.s32 4294967294, %s2555_s12   ;;  %s2646_s15 = sadd.s32 1, %s2555_s12  }
   0xc   : > { %3261 = sst [smem:[#allocation24_spill]] %s2646_s15  ;;  %s186_s16 = sadd.s32 1, %s2551_s11 }
   0xd   : > { %s183_s17 = ssub.s32 %s2555_s12, %s2646_s15  ;;  %p196_p0 = scmp.ne.s32.totalorder %s2551_s11, %s2547_s10 }
   0xe   : > { %p184_p1 = scmp.eq.s32.totalorder %s183_s17, 0  ;;  %p3251_p2 = scmp.eq.s32.totalorder %s2642_s13, 1 }
   0xf   : > { %p202_p3 = scmp.ne.s32.totalorder %s2547_s10, %s2543_s30  ;;  %p203_p4 = scmp.eq.s32.totalorder %s1725_s14, 1 }
  0x10   : > { %s2657_s18 = scalar_select %p184_p1, %s2551_s11, %s186_s16  }
  0x11   : > { %p2661_p5 = por %p3251_p2, %p196_p0  ;;  %p2665_p6 = por %p203_p4, %p202_p3 }
  0x12   : > { %3262 = sst [smem:[#allocation25_spill]] %s2657_s18  ;;  %p1726_p7 = scmp.ge.s32.totalorder %s2555_s12, 1 }
  0x13   : > { %s3263_s19 = scalar_select %p2661_p5, 1, 0 }
  0x14   : > { %s3264_s20 = scalar_select %p2665_p6, 1, 0 }
  0x15   : > { %p252_p8 = scmp.lt.s32.totalorder %s2555_s12, 3  ;;  %p3252_p10 = scmp.eq.s32.totalorder %s2642_s13, 0 }
  0x16   : > { %s2557_s22 = smov [#allocation9]   ;;  %s2558_s24 = smov [#allocation6]  }
  0x17   : > { %p2673_p11 = pnand %p1726_p7, %p252_p8  ;;  %s276_s23 = sshll.u32 %s2557_s22, 4  ;;  %s277_s23 = int_to_ptr.vmem [resolvable:$true] %s276_s23 }
  0x18   : > { %s265_s25 = sshll.u32 %s2558_s24, 4  ;;  %s2559_s27 = smov [#allocation11]   ;;  %s2685_s25 = int_to_ptr.vmem [resolvable:$true] %s265_s25 }
  0x19   : > { %s3265_s21 = scalar_select %p2673_p11, 1, 0 }
  0x1a   : > { %p2174_p12 = pneg %p2673_p11  ;;  %s289_s28 = sshll.u32 %s2559_s27, 4  ;;  %s2687_s28 = int_to_ptr.vmem [resolvable:$true] %s289_s28 }
  0x1b   : > { %s3267_s2 = sld [smem:[#allocation27_spill]] }
  0x1c   : > { %p2681_p13 = pnand %p3252_p10, %p2174_p12 }
  0x1e   : > { %p2697_p1 = pneg %p2681_p13 }
  0x21   : > { %s2313_s16 = scalar_lea.hbm %s3267_s2, 128 }
  0x22   : > { %p2314_p0 = scmp.ne.s32.totalorder %s3267_s2, %s2313_s16  ;;  %p2320_p7 = scmp.lt.u32.totalorder %s2313_s16, %s3267_s2 }
  0x24   : > { %p2316_p3 = pnand %p2697_p1, %p2314_p0 }
  0x26   : > { %p2317_p4 = pneg %p2316_p3 }
  0x28   : > { %p2322_p8 = pnand %p2320_p7, %p2317_p4 }
  0x2a   : > { %2325 = shalt.err (!%p2322_p8)
}
  0x2b   : > { %s2326_s29 = scalar_lea.vmem %s277_s23, 128  ;;  %p2334_p10 = scmp.lt.s32.totalorder %s277_s23, %s277_s23 }
  0x2c   : > { %p2327_p12 = scmp.ne.s32.totalorder %s277_s23, %s2326_s29  ;;  %p2335_p6 = scmp.lt.s32.totalorder %s2326_s29, %s2326_s29 }
  0x2e   : > { %p2329_p2 = pnand %p2327_p12, %p2697_p1  ;;  %p2336_p5 = por %p2335_p6, %p2334_p10 }
  0x30   : > { %p2330_p9 = pneg %p2329_p2 }
  0x32   : > { %p2337_p11 = pnand %p2336_p5, %p2330_p9 }
  0x34   : > { %2340 = shalt.err (!%p2337_p11)
}
  0x35   : > { %2180 = dma.hbm_to_vmem [thread:$0]  (!%p2681_p13), %s3267_s2, 128, %s277_s23, [#allocation10]  }
  0x36   : > { %s3269_s1 = sld [smem:[#allocation26_spill]] }
  0x3c   : > { %s2341_s22 = scalar_lea.hbm %s3269_s1, 128 }
  0x3d   : > { %p2342_p2 = scmp.ne.s32.totalorder %s3269_s1, %s2341_s22  ;;  %p2348_p5 = scmp.lt.u32.totalorder %s2341_s22, %s3269_s1 }
  0x3f   : > { %p2344_p0 = pnand %p2342_p2, %p2697_p1 }
  0x41   : > { %p2345_p6 = pneg %p2344_p0 }
  0x43   : > { %p2350_p9 = pnand %p2348_p5, %p2345_p6 }
  0x45   : > { %2353 = shalt.err (!%p2350_p9)
}
  0x46   : > { %s2354_s23 = scalar_lea.vmem %s2685_s25, 128  ;;  %p2362_p4 = scmp.lt.s32.totalorder %s2685_s25, %s2685_s25 }
  0x47   : > { %p2355_p10 = scmp.ne.s32.totalorder %s2685_s25, %s2354_s23  ;;  %p2363_p7 = scmp.lt.s32.totalorder %s2354_s23, %s2354_s23 }
  0x49   : > { %p2357_p11 = pnand %p2355_p10, %p2697_p1  ;;  %p2364_p8 = por %p2363_p7, %p2362_p4 }
  0x4b   : > { %p2358_p3 = pneg %p2357_p11 }
  0x4d   : > { %p2365_p12 = pnand %p2364_p8, %p2358_p3 }
  0x4f   : > { %2368 = shalt.err (!%p2365_p12)
}
  0x50   : > { %2177 = dma.hbm_to_vmem [thread:$0]  (!%p2681_p13), %s3269_s1, 128, %s2685_s25, [#allocation7]  }
  0x51   : > { %s2369_s18 = scalar_lea.hbm %s3245_s4, 8192 }
  0x52   : > { %p2370_p2 = scmp.ne.s32.totalorder %s3245_s4, %s2369_s18  ;;  %p2376_p5 = scmp.lt.u32.totalorder %s2369_s18, %s3245_s4 }
  0x54   : > { %p2372_p0 = pnand %p2370_p2, %p2697_p1 }
  0x56   : > { %p2373_p6 = pneg %p2372_p0 }
  0x58   : > { %p2378_p9 = pnand %p2376_p5, %p2373_p6 }
  0x5a   : > { %2381 = shalt.err (!%p2378_p9)
}
  0x5b   : > { %s2382_s25 = scalar_lea.vmem %s2687_s28, 8192  ;;  %p2390_p4 = scmp.lt.s32.totalorder %s2687_s28, %s2687_s28 }
  0x5c   : > { %p2383_p10 = scmp.ne.s32.totalorder %s2687_s28, %s2382_s25  ;;  %p2391_p7 = scmp.lt.s32.totalorder %s2382_s25, %s2382_s25 }
  0x5e   : > { %p2385_p11 = pnand %p2383_p10, %p2697_p1  ;;  %p2392_p8 = por %p2391_p7, %p2390_p4 }
  0x60   : > { %p2386_p3 = pneg %p2385_p11 }
  0x62   : > { %p2393_p12 = pnand %p2392_p8, %p2386_p3 }
  0x64   : > { %2396 = shalt.err (!%p2393_p12)
}
  0x65   : > { %s2560_s23 = smov 512   ;;  %s2561_s11 = smov 32  }
  0x66   : > { %2183 = dma.hbm_to_vmem [thread:$0]  (!%p2681_p13), %s3245_s4, 8192, %s2687_s28, [#allocation10], %s2560_s23, %s2560_s23, %s2561_s11  }
  0x67   : > { %s2562_s17 = smov [#allocation12]   ;;  %s2397_s27 = scalar_lea.hbm %s3246_s5, 2048 }
  0x68   : > { %s302_s18 = sshll.u32 %s2562_s17, 4  ;;  %p2398_p2 = scmp.ne.s32.totalorder %s3246_s5, %s2397_s27  ;;  %s303_s18 = int_to_ptr.vmem [resolvable:$true] %s302_s18 }
  0x69   : > { %p2404_p5 = scmp.lt.u32.totalorder %s2397_s27, %s3246_s5 }
  0x6a   : > { %p2400_p0 = pnand %p2398_p2, %p2697_p1 }
  0x6c   : > { %p2401_p6 = pneg %p2400_p0 }
  0x6e   : > { %p2406_p9 = pnand %p2404_p5, %p2401_p6 }
  0x70   : > { %2409 = shalt.err (!%p2406_p9)
}
  0x71   : > { %s2410_s28 = scalar_lea.vmem %s303_s18, 2048  ;;  %p2418_p4 = scmp.lt.s32.totalorder %s303_s18, %s303_s18 }
  0x72   : > { %p2411_p10 = scmp.ne.s32.totalorder %s303_s18, %s2410_s28  ;;  %p2419_p7 = scmp.lt.s32.totalorder %s2410_s28, %s2410_s28 }
  0x74   : > { %p2413_p11 = pnand %p2411_p10, %p2697_p1  ;;  %p2420_p8 = por %p2419_p7, %p2418_p4 }
  0x76   : > { %p2414_p3 = pneg %p2413_p11 }
  0x78   : > { %p2421_p12 = pnand %p2420_p8, %p2414_p3 }
  0x7a   : > { %2424 = shalt.err (!%p2421_p12)
}
  0x7b   : > { %s2563_s23 = smov 128   ;;  %s2564_s11 = smov 8  }
  0x7c   : > { %2186 = dma.hbm_to_vmem [thread:$0]  (!%p2681_p13), %s3246_s5, 2048, %s303_s18, [#allocation13], %s2563_s23, %s2563_s23, %s2564_s11  }
  0x7d   : > { %p3270_p2 = scmp.ne.s32.totalorder %s3265_s21, 0 }
  0x7e   : > { %p3271_p0 = scmp.eq.s32.totalorder (!%p3270_p2), %s2642_s13, 0 }
  0x7f   : > { %330 = sbr.rel (%p3270_p2) target bundleno = 1523 (0x5f3), region = 48 }
  0x86   : > { %2522 = dma.done.wait (%p3271_p0), [#allocation7], 128   ;;  %p3272_p1 = pmov %p3271_p0 }
  0x87   : > { %p3273_p6 = pmov %p3271_p0 }
  0x88   : > { %2524 = vsyncadd (%p3272_p1), [#allocation7], 4294967168 }
  0x89   : > { %2526 = dma.done.wait (%p3273_p6), [#allocation10], 8320   ;;  %p3274_p5 = pmov %p3271_p0 }
  0x8a   : > { %p3275_p9 = pmov %p3271_p0 }
  0x8b   : > { %2528 = vsyncadd (%p3274_p5), [#allocation10], 4294958976 }
  0x8c   : > { %2530 = dma.done.wait (%p3275_p9), [#allocation13], 2048   ;;  %p3276_p13 = pmov %p3271_p0 }
  0x8d   : > { %s371_s2 = sand.u32 1, %s2547_s10   ;;  %s2793_s21 = sshll.u32 %s2642_s13, 2 }
  0x8e   : > { %2532 = vsyncadd (%p3276_p13), [#allocation13], 4294965248  ;;  %s1737_s26 = sshll.u32 %s371_s2, 5  ;;  %p379_p10 = scmp.lt.s32.totalorder %s2793_s21, 7 }
  0x8f   : > { %s2804_s22 = scalar_lea.vmem [#allocation14], %s1737_s26  ;;  %p3277_p11 = scmp.ne.s32.totalorder %s2642_s13, 0 }
  0x90   : > { %s380_s24 = scalar_select %p379_p10, %s2793_s21, 7 }
  0x91   : > { %388 = sbr.rel (%p3277_p11) target bundleno = 152 (0x98), region = 68  ;;  %v389_v0 = vld [vmem:[#allocation6] sm:$0xff] (!%p3277_p11)  ;;  %v391_v1 = vld [vmem:[#allocation9] sm:$0xff] (!%p3277_p11) }
  0x92   : > { %s1739_s14 = sshll.u32 %s380_s24, 3  ;;  %390 = vst [vmem:[#allocation4] sm:$0xff] (!%p3277_p11), %v389_v0  ;;  %392 = vst [vmem:[#allocation5] sm:$0xff] (!%p3277_p11), %v391_v1 }
  0x93   : > { %s2802_s16 = scalar_lea.vmem %s3241_s0, %s1739_s14 }
  0x98 PF: > { %v398_v2 = vld [vmem:[%s3244_s3 + $0x8] sm:$0xff]  ;;  %v397_v7 = vld [vmem:[%s3244_s3] sm:$0xff]  ;;  %v2565_v9 = vmov 0.0   ;;  %vm422_vm0 = vcmask 1040384   ;;  %v400_v24 = vld [vmem:[%s3244_s3 + $0x18] sm:$0xff]  ;;  %vm409_vm1 = vcmask 138240  }
  0x99   : > { %v402_v3 = vld [vmem:[%s3244_s3 + $0x28] sm:$0xff]  ;;  %v401_v8 = vld [vmem:[%s3244_s3 + $0x20] sm:$0xff]  ;;  %499 = vmatprep.mubr.f32.mxu1 %v2565_v9  ;;  %767 = vmatprep.mubr.f32.mxu0 %v2565_v9  ;;  %v404_v25 = vld [vmem:[%s3244_s3 + $0x38] sm:$0xff]  ;;  %p873_p3 = scmp.lt.s32.totalorder %s2793_s21, 8  ;;  %s1057_s17 = sadd.s32 1, %s2793_s21 }
  0x9a   : > { %v630_v4 = vld [vmem:[#allocation11 + $0x8] sm:$0xff]  ;;  %v1836_v5 = vpack.c.bf16 %v402_v3, %v398_v2  ;;  %v1838_v11 = vpack.c.bf16 %v401_v8, %v397_v7  ;;  %v629_v12 = vld [vmem:[#allocation11] sm:$0xff]  ;;  %v399_v26 = vld [vmem:[%s3244_s3 + $0x10] sm:$0xff]  ;;  %v1840_v27 = vpack.c.bf16 %v404_v25, %v400_v24  ;;  %p1058_p4 = scmp.lt.s32.totalorder %s1057_s17, 8  ;;  %s1243_s27 = sadd.s32 2, %s2793_s21 }
  0x9b   : > { %v634_v6 = vld [vmem:[#allocation11 + $0x28] sm:$0xff]  ;;  %v633_v13 = vld [vmem:[#allocation11 + $0x20] sm:$0xff]  ;;  %v403_v28 = vld [vmem:[%s3244_s3 + $0x30] sm:$0xff]  ;;  %p1244_p7 = scmp.lt.s32.totalorder %s1243_s27, 8  ;;  %s1429_s25 = sadd.s32 3, %s2793_s21 }
  0x9c   : > { %v2822_v10 = vpack.c.bf16 %v634_v6, %v630_v4  ;;  %v406_v14 = vld [vmem:[%s3244_s3 + $0x48] sm:$0x1]  ;;  %1837 = vmatprep.subr.bf16.mxu1 %v1836_v5  ;;  %v2827_v15 = vpack.c.bf16 %v633_v13, %v629_v12  ;;  %v405_v18 = vld [vmem:[%s3244_s3 + $0x40] sm:$0x1]  ;;  %v1842_v31 = vpack.c.bf16 %v403_v28, %v399_v26  ;;  %v408_v38 = vld [vmem:[%s3244_s3 + $0x58] sm:$0x1] }
  0x9d   : > { %v638_v16 = vld [vmem:[#allocation11 + $0x48] sm:$0xff]  ;;  %1839 = vmatpush1.bf16.msra.mxu1 %v1838_v11  ;;  %v637_v20 = vld [vmem:[#allocation11 + $0x40] sm:$0xff]  ;;  %v407_v45 = vld [vmem:[%s3244_s3 + $0x50] sm:$0x1]  ;;  %s1059_s18 = scalar_select %p1058_p4, 1, 0 }
  0x9e   : > { %v642_v17 = vld [vmem:[#allocation11 + $0x68] sm:$0xff]  ;;  %1845 = vmatprep.subr.bf16.mxu0 %v2822_v10  ;;  %v641_v21 = vld [vmem:[#allocation11 + $0x60] sm:$0xff]  ;;  %1741 = vmatprep.subr.msk.mxu1 %vm422_vm0, %v406_v14  ;;  %v632_v47 = vld [vmem:[#allocation11 + $0x18] sm:$0xff]  ;;  %s1245_s29 = scalar_select %p1244_p7, 1, 0 }
  0x9f   : > { %v2833_v19 = vpack.c.bf16 %v642_v17, %v638_v16  ;;  %v2836_v22 = vld [vmem:[%s2802_s16] sm:$0xff]  ;;  %1847 = vmatpush1.bf16.msra.mxu0 %v2827_v15  ;;  %v2840_v23 = vpack.c.bf16 %v641_v21, %v637_v20  ;;  %v646_v29 = vld [vmem:[#allocation11 + $0x88] sm:$0xff]  ;;  %v636_v48 = vld [vmem:[#allocation11 + $0x38] sm:$0xff]  ;;  %p1430_p8 = scmp.lt.s32.totalorder %s1429_s25, 8  ;;  %p1767_p12 = scmp.ne.s32.totalorder %s2642_s13, 1 }
  0xa0   : > { %v650_v30 = vld [vmem:[#allocation11 + $0xa8] sm:$0xff]  ;;  %v645_v33 = vld [vmem:[#allocation11 + $0x80] sm:$0xff]  ;;  %v2885_v49 = vld [vmem:[%s2802_s16 + $0x10] sm:$0xff]  ;;  %v2889_v53 = vpack.c.bf16 %v636_v48, %v632_v47 }
  0xa1   : > { %1849 = vmatprep.subr.bf16.mxu0 %v2833_v19  ;;  %v2855_v32 = vpack.c.bf16 %v650_v30, %v646_v29  ;;  %v649_v34 = vld [vmem:[#allocation11 + $0xa0] sm:$0xff]  ;;  %1742 = vmatpush1.msk.msra.mxu1 %vm422_vm0, %v405_v18  ;;  %v654_v35 = vld [vmem:[#allocation11 + $0xc8] sm:$0xff]  ;;  %v2899_v57 = vld [vmem:[%s2802_s16 + $0x18] sm:$0xff]  ;;  %s1431_s28 = scalar_select %p1430_p8, 1, 0 }
  0xa2   : > { %v658_v36 = vld [vmem:[#allocation11 + $0xe8] sm:$0xff]  ;;  %1743 = vmatmul.mubr.msk.f32.vlgmr.msra.gmra.mrb[0].mxu1 %vm409_vm1, %v2836_v22  ;;  %v2861_v37 = vpack.c.bf16 %v649_v34, %v645_v33  ;;  %1841 = vmatprep.subr.bf16.mxu1 %v1840_v27  ;;  %v653_v41 = vld [vmem:[#allocation11 + $0xc0] sm:$0xff]  ;;  %v631_v61 = vld [vmem:[#allocation11 + $0x10] sm:$0xff] }
  0xa3   : > { %1851 = vmatpush1.bf16.msra.mxu0 %v2840_v23  ;;  %v2868_v39 = vld [vmem:[%s2802_s16 + $0x8] sm:$0xff]  ;;  %v2870_v40 = vpack.c.bf16 %v658_v36, %v654_v35  ;;  %v657_v42 = vld [vmem:[#allocation11 + $0xe0] sm:$0xff]  ;;  %1843 = vmatpush1.bf16.msra.mxu1 %v1842_v31  ;;  %v635_v62 = vld [vmem:[#allocation11 + $0x30] sm:$0xff]  ;;  %s874_s16 = scalar_select %p873_p3, 1, 0 }
  0xa4   : > { %1853 = vmatprep.subr.bf16.mxu0 %v2855_v32  ;;  %505 = vmatprep.mubr.f32.mxu1 %v2565_v9  ;;  %v662_v43 = vld [vmem:[#allocation11 + $0x108] sm:$0xff]  ;;  %v2880_v46 = vpack.c.bf16 %v657_v42, %v653_v41  ;;  %v661_v51 = vld [vmem:[#allocation11 + $0x100] sm:$0xff]  ;;  %v640_v1 = vld [vmem:[#allocation11 + $0x58] sm:$0xff]  ;;  %v2912_v4 = vpack.c.bf16 %v635_v62, %v631_v61 }
  0xa5   : > { %v666_v44 = vld [vmem:[#allocation11 + $0x128] sm:$0xff]  ;;  %1747 = vmatprep.subr.msk.mxu1 %vm422_vm0, %v408_v38  ;;  %v665_v52 = vld [vmem:[#allocation11 + $0x120] sm:$0xff]  ;;  %v644_v2 = vld [vmem:[#allocation11 + $0x78] sm:$0xff] }
  0xa6   : > { %1744 = vmatmul.mubr.msk.f32.gmra.mrb[2].mxu1 %vm409_vm1, %v2868_v39  ;;  %v2887_v50 = vpack.c.bf16 %v666_v44, %v662_v43  ;;  %v670_v54 = vld [vmem:[#allocation11 + $0x148] sm:$0xff]  ;;  %v2896_v56 = vpack.c.bf16 %v665_v52, %v661_v51  ;;  %v669_v59 = vld [vmem:[#allocation11 + $0x140] sm:$0xff]  ;;  %v639_v8 = vld [vmem:[#allocation11 + $0x50] sm:$0xff]  ;;  %v2916_v11 = vpack.c.bf16 %v644_v2, %v640_v1 }
  0xa7   : > { %1855 = vmatpush1.bf16.msra.mxu0 %v2861_v37  ;;  %511 = vmatprep.mubr.f32.mxu1 %v2565_v9  ;;  %v674_v55 = vld [vmem:[#allocation11 + $0x168] sm:$0xff]  ;;  %v673_v60 = vld [vmem:[#allocation11 + $0x160] sm:$0xff]  ;;  %v643_v12 = vld [vmem:[#allocation11 + $0x70] sm:$0xff] }
  0xa8   : > { %1857 = vmatprep.subr.bf16.mxu0 %v2870_v40  ;;  %1748 = vmatpush1.msk.msra.mxu1 %vm422_vm0, %v407_v45  ;;  %v2903_v58 = vpack.c.bf16 %v674_v55, %v670_v54  ;;  %v678_v63 = vld [vmem:[#allocation11 + $0x188] sm:$0xff]  ;;  %v2908_v3 = vpack.c.bf16 %v673_v60, %v669_v59  ;;  %v677_v6 = vld [vmem:[#allocation11 + $0x180] sm:$0xff]  ;;  %v648_v16 = vld [vmem:[#allocation11 + $0x98] sm:$0xff]  ;;  %v2925_v20 = vpack.c.bf16 %v643_v12, %v639_v8 }
  0xa9   : > { %1877 = vmatprep.subr.bf16.mxu1 %v2889_v53  ;;  %v682_v0 = vld [vmem:[#allocation11 + $0x1a8] sm:$0xff]  ;;  %v681_v7 = vld [vmem:[#allocation11 + $0x1a0] sm:$0xff]  ;;  %v652_v17 = vld [vmem:[#allocation11 + $0xb8] sm:$0xff] }
  0xaa   : > { %1745 = vmatmul.mubr.msk.f32.gmra.mrb[4].mxu1 %vm409_vm1, %v2885_v49  ;;  %v2914_v5 = vpack.c.bf16 %v682_v0, %v678_v63  ;;  %v686_v13 = vld [vmem:[#allocation11 + $0x1c8] sm:$0xff]  ;;  %v2921_v18 = vpack.c.bf16 %v681_v7, %v677_v6  ;;  %v685_v24 = vld [vmem:[#allocation11 + $0x1c0] sm:$0xff]  ;;  %v2930_v26 = vpack.c.bf16 %v652_v17, %v648_v16  ;;  %v647_v27 = vld [vmem:[#allocation11 + $0x90] sm:$0xff] }
  0xab   : > { %1859 = vmatpush1.bf16.msra.mxu0 %v2880_v46  ;;  %517 = vmatprep.mubr.f32.mxu1 %v2565_v9  ;;  %v690_v14 = vld [vmem:[#allocation11 + $0x1e8] sm:$0xff]  ;;  %v689_v25 = vld [vmem:[#allocation11 + $0x1e0] sm:$0xff]  ;;  %v651_v28 = vld [vmem:[#allocation11 + $0xb0] sm:$0xff] }
  0xac   : > { %1861 = vmatprep.subr.bf16.mxu0 %v2887_v50  ;;  %v2927_v21 = vpack.c.bf16 %v690_v14, %v686_v13  ;;  %v660_v29 = vld [vmem:[#allocation11 + $0xf8] sm:$0xff]  ;;  %v2934_v30 = vpack.c.bf16 %v689_v25, %v685_v24  ;;  %v2940_v31 = vpack.c.bf16 %v651_v28, %v647_v27  ;;  %v655_v34 = vld [vmem:[#allocation11 + $0xd0] sm:$0xff]  ;;  %v2947_v41 = vld [vmem:[#allocation4] sm:$0xff] }
  0xad   : > { %v659_v35 = vld [vmem:[#allocation11 + $0xf0] sm:$0xff]  ;;  %v664_v36 = vld [vmem:[#allocation11 + $0x118] sm:$0xff] }
  0xae   : > { %1746 = vmatmul.mubr.msk.f32.gmra.mrb[6].mxu1 %vm409_vm1, %v2899_v57  ;;  %v668_v38 = vld [vmem:[#allocation11 + $0x138] sm:$0xff]  ;;  %v663_v43 = vld [vmem:[#allocation11 + $0x110] sm:$0xff] }
  0xaf   : > { %1863 = vmatpush1.bf16.msra.mxu0 %v2896_v56  ;;  %588 = vmatprep.mubr.f32.mxu1 %v2565_v9  ;;  %v2956_v42 = vpack.c.bf16 %v668_v38, %v664_v36  ;;  %v667_v44 = vld [vmem:[#allocation11 + $0x130] sm:$0xff]  ;;  %v672_v45 = vld [vmem:[#allocation11 + $0x158] sm:$0xff] }
  0xb0   : > { %1865 = vmatprep.subr.bf16.mxu0 %v2903_v58  ;;  %v676_v47 = vld [vmem:[#allocation11 + $0x178] sm:$0xff]  ;;  %v2964_v48 = vpack.c.bf16 %v667_v44, %v663_v43  ;;  %v671_v51 = vld [vmem:[#allocation11 + $0x150] sm:$0xff] }
  0xb1   : > { %v675_v52 = vld [vmem:[#allocation11 + $0x170] sm:$0xff]  ;;  %v680_v54 = vld [vmem:[#allocation11 + $0x198] sm:$0xff] }
  0xb2   : > { %1749 = vmatmul.mubr.msk.f32.vlgmr.msra.gmra.mrb[8].mxu1 %vm409_vm1, %v2836_v22  ;;  %v656_v22 = vld [vmem:[#allocation11 + $0xd8] sm:$0xff]  ;;  %v679_v60 = vld [vmem:[#allocation11 + $0x190] sm:$0xff] }
  0xb3   : > { %1867 = vmatpush1.bf16.msra.mxu0 %v2908_v3  ;;  %1879 = vmatpush1.bf16.msra.mxu1 %v2912_v4  ;;  %v2943_v33 = vpack.c.bf16 %v660_v29, %v656_v22  ;;  %v684_v55 = vld [vmem:[#allocation11 + $0x1b8] sm:$0xff]  ;;  %v683_v61 = vld [vmem:[#allocation11 + $0x1b0] sm:$0xff] }
  0xb4   : > { %1869 = vmatprep.subr.bf16.mxu0 %v2914_v5  ;;  %1881 = vmatprep.subr.bf16.mxu1 %v2916_v11  ;;  %v2978_v59 = vpack.c.bf16 %v684_v55, %v680_v54  ;;  %v688_v62 = vld [vmem:[#allocation11 + $0x1d8] sm:$0xff]  ;;  %v2982_v0 = vpack.c.bf16 %v683_v61, %v679_v60  ;;  %v687_v2 = vld [vmem:[#allocation11 + $0x1d0] sm:$0xff]  ;;  %v695_v54 = vld [vmem:[#allocation5] sm:$0xff]  ;;  %v875_v60 = vstv %s874_s16 }
  0xb5   : > { %594 = vmatprep.mubr.f32.mxu1 %v2565_v9  ;;  %v692_v63 = vld [vmem:[#allocation11 + $0x1f8] sm:$0xff]  ;;  %v691_v6 = vld [vmem:[#allocation11 + $0x1f0] sm:$0xff]  ;;  %vm876_vm2 = vcmp.eq.s32.totalorder %v875_v60, 1 }
  0xb6   : > { %1750 = vmatmul.mubr.msk.f32.gmra.mrb[10].mxu1 %vm409_vm1, %v2868_v39  ;;  %v2952_v39 = vpack.c.bf16 %v659_v35, %v655_v34  ;;  %v2986_v1 = vpack.c.bf16 %v692_v63, %v688_v62  ;;  %v2990_v7 = vpack.c.bf16 %v691_v6, %v687_v2 }
  0xb7   : > { %1871 = vmatpush1.bf16.msra.mxu0 %v2921_v18  ;;  %1883 = vmatpush1.bf16.msra.mxu1 %v2925_v20 }
  0xb8   : > { %1873 = vmatprep.subr.bf16.mxu0 %v2927_v21  ;;  %1885 = vmatprep.subr.bf16.mxu1 %v2930_v26 }
  0xb9   : > { %600 = vmatprep.mubr.f32.mxu1 %v2565_v9 }
  0xba   : > { %1751 = vmatmul.mubr.msk.f32.gmra.mrb[12].mxu1 %vm409_vm1, %v2885_v49  ;;  %v2968_v49 = vpack.c.bf16 %v676_v47, %v672_v45 }
  0xbb   : > { %1875 = vmatpush1.bf16.msra.mxu0 %v2934_v30  ;;  %1887 = vmatpush1.bf16.msra.mxu1 %v2940_v31 }
  0xbc   : > { %606 = vmatprep.mubr.f32.mxu1 %v2565_v9  ;;  %1889 = vmatprep.subr.bf16.mxu1 %v2943_v33 }
  0xbd   : > { %1909 = vmatprep.subr.bf16.mxu0 %v2822_v10 }
  0xbe   : > { %768 = vmatmul.mubr.f32.vlgmr.msra.gmra.mrb[0].mxu0 %v2947_v41  ;;  %1752 = vmatmul.mubr.msk.f32.gmra.mrb[14].mxu1 %vm409_vm1, %v2899_v57  ;;  %v2974_v57 = vpack.c.bf16 %v675_v52, %v671_v51 }
  0xbf   : > { %1911 = vmatpush1.bf16.msra.mxu0 %v2827_v15  ;;  %1891 = vmatpush1.bf16.msra.mxu1 %v2952_v39 }
  0xc0   : > { %838 = vmatprep.mubr.f32.mxu1 %v2565_v9  ;;  %1893 = vmatprep.subr.bf16.mxu1 %v2956_v42 }
  0xc1   : > { %1913 = vmatprep.subr.bf16.mxu0 %v2833_v19  ;;  %951 = vmatprep.mubr.f32.mxu0 %v2565_v9 }
  0xc3   : > { %1915 = vmatpush1.bf16.msra.mxu0 %v2840_v23  ;;  %1895 = vmatpush1.bf16.msra.mxu1 %v2964_v48 }
  0xc4   : > { %1917 = vmatprep.subr.bf16.mxu0 %v2855_v32  ;;  %1897 = vmatprep.subr.bf16.mxu1 %v2968_v49 }
  0xc7   : > { %1919 = vmatpush1.bf16.msra.mxu0 %v2861_v37  ;;  %1899 = vmatpush1.bf16.msra.mxu1 %v2974_v57 }
  0xc8   : > { %1921 = vmatprep.subr.bf16.mxu0 %v2870_v40  ;;  %1901 = vmatprep.subr.bf16.mxu1 %v2978_v59 }
  0xcb   : > { %1923 = vmatpush1.bf16.msra.mxu0 %v2880_v46  ;;  %1903 = vmatpush1.bf16.msra.mxu1 %v2982_v0 }
  0xcc   : > { %1925 = vmatprep.subr.bf16.mxu0 %v2887_v50  ;;  %1905 = vmatprep.subr.bf16.mxu1 %v2986_v1 }
  0xcf   : > { %1927 = vmatpush1.bf16.msra.mxu0 %v2896_v56  ;;  %1907 = vmatpush1.bf16.msra.mxu1 %v2990_v7 }
  0xd0   : > { %1929 = vmatprep.subr.bf16.mxu0 %v2903_v58  ;;  %1941 = vmatprep.subr.bf16.mxu1 %v2889_v53 }
  0xd2   : > { %839 = vmatmul.mubr.f32.vlgmr.msra.gmra.mrb[8].mxu1 %v2947_v41 }
  0xd3   : > { %1931 = vmatpush1.bf16.msra.mxu0 %v2908_v3  ;;  %1943 = vmatpush1.bf16.msra.mxu1 %v2912_v4 }
  0xd4   : > { %1933 = vmatprep.subr.bf16.mxu0 %v2914_v5  ;;  %1945 = vmatprep.subr.bf16.mxu1 %v2916_v11 }
  0xd5   : > { %1022 = vmatprep.mubr.f32.mxu1 %v2565_v9 }
  0xd7   : > { %1935 = vmatpush1.bf16.msra.mxu0 %v2921_v18  ;;  %1947 = vmatpush1.bf16.msra.mxu1 %v2925_v20 }
  0xd8   : > { %1937 = vmatprep.subr.bf16.mxu0 %v2927_v21  ;;  %1949 = vmatprep.subr.bf16.mxu1 %v2930_v26 }
  0xdb   : > { %1939 = vmatpush1.bf16.msra.mxu0 %v2934_v30  ;;  %1951 = vmatpush1.bf16.msra.mxu1 %v2940_v31 }
  0xdc   : > { %1973 = vmatprep.subr.bf16.mxu0 %v2822_v10  ;;  %1953 = vmatprep.subr.bf16.mxu1 %v2943_v33 }
  0xdf   : > { %1955 = vmatpush1.bf16.msra.mxu1 %v2952_v39 }
  0xe0   : > { %1957 = vmatprep.subr.bf16.mxu1 %v2956_v42 }
  0xe3   : > { %1959 = vmatpush1.bf16.msra.mxu1 %v2964_v48 }
  0xe4   : > { %1961 = vmatprep.subr.bf16.mxu1 %v2968_v49 }
  0xe7   : > { %1963 = vmatpush1.bf16.msra.mxu1 %v2974_v57 }
  0xe8   : > { %1965 = vmatprep.subr.bf16.mxu1 %v2978_v59 }
  0xeb   : > { %1967 = vmatpush1.bf16.msra.mxu1 %v2982_v0 }
  0xec   : > { %1969 = vmatprep.subr.bf16.mxu1 %v2986_v1 }
  0xef   : > { %1971 = vmatpush1.bf16.msra.mxu1 %v2990_v7 }
  0xf0   : > { %2005 = vmatprep.subr.bf16.mxu1 %v2889_v53 }
 0x175   : > { %v501_v8 = vpop.f32.mrb[0].mxu1 }
 0x176   : > { %v503_v12 = vpop.f32.mrb[1].mxu1 }
 0x179   : > { %v3022_v13 = vpop.f32.mrb[2].mxu1 }
 0x17a   : > { %v3024_v14 = vpop.f32.mrb[3].mxu1 }
 0x17d   : > { %v3026_v16 = vpop.f32.mrb[4].mxu1 }
 0x17e   : > { %v3028_v17 = vpop.f32.mrb[5].mxu1 }
 0x181   : > { %v3030_v24 = vpop.f32.mrb[6].mxu1 }
 0x182   : > { %v3032_v25 = vpop.f32.mrb[7].mxu1 }
 0x191   : > { %v769_v27 = vpop.f32.mrb[0].mxu0 }
 0x192   : > { %v845_v28 = vadd.f32 %v769_v27, %v501_v8  ;;  %v771_v22 = vpop.f32.mrb[1].mxu0 }
 0x193   : > { %v846_v29 = vadd.f32 %v771_v22, %v503_v12 }
 0x194   : > { %v1754_v34 = vmul.f32 -1.442695, %v845_v28 }
 0x195   : > { %v1755_v35 = vmul.f32 -1.442695, %v846_v29 }
 0x196   : > { %2249 = vpow2.f32 %v1754_v34 }
 0x197   : > { %2251 = vpow2.f32 %v1755_v35 }
 0x1a0   : > { %v2250_v36 = vpop.eup %2249 }
 0x1a1   : > { %v2252_v38 = vpop.eup %2251  ;;  %v858_v44 = vadd.f32 1.0, %v2250_v36 }
 0x1a2   : > { %v859_v43 = vadd.f32 1.0, %v2252_v38 }
 0x1a4   : > { %2253 = vrcp.f32 %v859_v43 }
 0x1a5   : > { %v840_v45 = vpop.f32.mrb[8].mxu1  ;;  %2255 = vrcp.f32 %v858_v44 }
 0x1a6   : > { %v1756_v47 = vmul.f32 -1.442695, %v840_v45  ;;  %v842_v51 = vpop.f32.mrb[9].mxu1 }
 0x1a7   : > { %2257 = vtanh.f32 %v842_v51 }
 0x1a8   : > { %2259 = vpow2.f32 %v1756_v47 }
 0x1ae   : > { %v2254_v52 = vpop.eup %2253 }
 0x1af   : > { %v2256_v55 = vpop.eup %2255  ;;  %v868_v2 = vmul.f32 %v2254_v52, %v695_v54 }
 0x1b1   : > { %v2258_v61 = vpop.eup %2257 }
 0x1b2   : > { %v2260_v62 = vpop.eup %2259  ;;  %v869_v63 = vmul.f32 %v2258_v61, %v2256_v55 }
 0x1b3   : > { %v860_v6 = vadd.f32 1.0, %v2260_v62 }
 0x1b4   : > { %v870_v8 = vadd.f32 %v869_v63, %v868_v2 }
 0x1b5   : > { %2261 = vrcp.f32 %v860_v6 }
 0x1b6   : > { %2263 = vtanh.f32 %v870_v8  ;;  %v3035_v12 = vsel %vm876_vm2, %v870_v8, %v695_v54 }
 0x1bf   : > { %v2262_v27 = vpop.eup %2261 }
 0x1c0   : > { %v2264_v28 = vpop.eup %2263 }
 0x1c1   : > { %v872_v22 = vmul.f32 %v2264_v28, %v2262_v27 }
 0x1c3   : > { %v3038_v29 = vsel %vm876_vm2, %v872_v22, %v2947_v41 }
 0x1c4   : > { %952 = vmatmul.mubr.f32.vlgmr.msra.gmra.mrb[2].mxu0 %v3038_v29  ;;  %1023 = vmatmul.mubr.f32.vlgmr.msra.gmra.mrb[10].mxu1 %v3038_v29 }
 0x1c5   : > { %1975 = vmatpush1.bf16.msra.mxu0 %v2827_v15  ;;  %2007 = vmatpush1.bf16.msra.mxu1 %v2912_v4 }
 0x1c6   : > { %1977 = vmatprep.subr.bf16.mxu0 %v2833_v19  ;;  %2009 = vmatprep.subr.bf16.mxu1 %v2916_v11 }
 0x1c7   : > { %1137 = vmatprep.mubr.f32.mxu0 %v2565_v9  ;;  %1208 = vmatprep.mubr.f32.mxu1 %v2565_v9 }
 0x1c9   : > { %1979 = vmatpush1.bf16.msra.mxu0 %v2840_v23  ;;  %2011 = vmatpush1.bf16.msra.mxu1 %v2925_v20 }
 0x1ca   : > { %1981 = vmatprep.subr.bf16.mxu0 %v2855_v32  ;;  %2013 = vmatprep.subr.bf16.mxu1 %v2930_v26 }
 0x1cd   : > { %1983 = vmatpush1.bf16.msra.mxu0 %v2861_v37  ;;  %2015 = vmatpush1.bf16.msra.mxu1 %v2940_v31 }
 0x1ce   : > { %1985 = vmatprep.subr.bf16.mxu0 %v2870_v40  ;;  %2017 = vmatprep.subr.bf16.mxu1 %v2943_v33 }
 0x1d1   : > { %1987 = vmatpush1.bf16.msra.mxu0 %v2880_v46  ;;  %2019 = vmatpush1.bf16.msra.mxu1 %v2952_v39 }
 0x1d2   : > { %1989 = vmatprep.subr.bf16.mxu0 %v2887_v50  ;;  %2021 = vmatprep.subr.bf16.mxu1 %v2956_v42 }
 0x1d5   : > { %1991 = vmatpush1.bf16.msra.mxu0 %v2896_v56  ;;  %2023 = vmatpush1.bf16.msra.mxu1 %v2964_v48 }
 0x1d6   : > { %1993 = vmatprep.subr.bf16.mxu0 %v2903_v58  ;;  %2025 = vmatprep.subr.bf16.mxu1 %v2968_v49 }
 0x1d9   : > { %1995 = vmatpush1.bf16.msra.mxu0 %v2908_v3  ;;  %2027 = vmatpush1.bf16.msra.mxu1 %v2974_v57 }
 0x1da   : > { %1997 = vmatprep.subr.bf16.mxu0 %v2914_v5  ;;  %2029 = vmatprep.subr.bf16.mxu1 %v2978_v59 }
 0x1dd   : > { %1999 = vmatpush1.bf16.msra.mxu0 %v2921_v18  ;;  %2031 = vmatpush1.bf16.msra.mxu1 %v2982_v0 }
 0x1de   : > { %2001 = vmatprep.subr.bf16.mxu0 %v2927_v21  ;;  %2033 = vmatprep.subr.bf16.mxu1 %v2986_v1 }
 0x1e1   : > { %2003 = vmatpush1.bf16.msra.mxu0 %v2934_v30  ;;  %2035 = vmatpush1.bf16.msra.mxu1 %v2990_v7 }
 0x1e2   : > { %2037 = vmatprep.subr.bf16.mxu0 %v2822_v10  ;;  %2069 = vmatprep.subr.bf16.mxu1 %v2889_v53 }
 0x297   : > { %v953_v41 = vpop.f32.mrb[2].mxu0  ;;  %v1024_v34 = vpop.f32.mrb[10].mxu1 }
 0x298   : > { %v1029_v35 = vadd.f32 %v953_v41, %v3022_v13  ;;  %v955_v36 = vpop.f32.mrb[3].mxu0  ;;  %v1026_v38 = vpop.f32.mrb[11].mxu1  ;;  %v1759_v47 = vmul.f32 -1.442695, %v1024_v34  ;;  %v1449_v41 = vld [vmem:[#allocation12 + $0x28] sm:$0xff] }
 0x299   : > { %v1030_v43 = vadd.f32 %v955_v36, %v3024_v14  ;;  %v1060_v14 = vstv %s1059_s18  ;;  %v1451_v36 = vld [vmem:[#allocation12 + $0x38] sm:$0xff] }
 0x29a   : > { %v1757_v44 = vmul.f32 -1.442695, %v1029_v35  ;;  %vm1061_vm3 = vcmp.eq.s32.totalorder %v1060_v14, 1  ;;  %v1450_v35 = vld [vmem:[#allocation12 + $0x30] sm:$0xff] }
 0x29b   : > { %v1758_v45 = vmul.f32 -1.442695, %v1030_v43  ;;  %v1452_v43 = vld [vmem:[#allocation12 + $0x40] sm:$0xff] }
 0x29c   : > { %2265 = vpow2.f32 %v1757_v44  ;;  %v1453_v44 = vld [vmem:[#allocation12 + $0x48] sm:$0xff] }
 0x29d   : > { %2267 = vpow2.f32 %v1758_v45  ;;  %v2116_v45 = vpack.c.bf16 %v1453_v44, %v1452_v43 }
 0x29e   : > { %2269 = vpow2.f32 %v1759_v47  ;;  %v1454_v47 = vld [vmem:[#allocation12 + $0x50] sm:$0xff] }
 0x29f   : > { %2271 = vtanh.f32 %v1026_v38  ;;  %v2112_v38 = vpack.c.bf16 %v1451_v36, %v1450_v35 }
 0x2a6   : > { %v2266_v51 = vpop.eup %2265 }
 0x2a7   : > { %v2268_v52 = vpop.eup %2267  ;;  %v1042_v54 = vadd.f32 1.0, %v2266_v51  ;;  %v1455_v51 = vld [vmem:[#allocation12 + $0x58] sm:$0xff] }
 0x2a8   : > { %v1043_v10 = vadd.f32 1.0, %v2268_v52  ;;  %v2270_v53 = vpop.eup %2269  ;;  %v2120_v52 = vpack.c.bf16 %v1455_v51, %v1454_v47 }
 0x2a9   : > { %2273 = vrcp.f32 %v1042_v54  ;;  %v2272_v13 = vpop.eup %2271  ;;  %v1044_v61 = vadd.f32 1.0, %v2270_v53  ;;  %v1456_v54 = vld [vmem:[#allocation12 + $0x60] sm:$0xff]  ;;  %v1458_v53 = vld [vmem:[#allocation12 + $0x70] sm:$0xff] }
 0x2aa   : > { %2275 = vrcp.f32 %v1043_v10  ;;  %v1457_v10 = vld [vmem:[#allocation12 + $0x68] sm:$0xff] }
 0x2ab   : > { %2277 = vrcp.f32 %v1044_v61 }
 0x2b3   : > { %v2274_v55 = vpop.eup %2273 }
 0x2b4   : > { %v2276_v60 = vpop.eup %2275  ;;  %v1053_v62 = vmul.f32 %v2274_v55, %v2272_v13  ;;  %v1459_v13 = vld [vmem:[#allocation12 + $0x78] sm:$0xff] }
 0x2b5   : > { %v1052_v63 = vmul.f32 %v2276_v60, %v3035_v12  ;;  %v2278_v8 = vpop.eup %2277  ;;  %v2128_v55 = vpack.c.bf16 %v1459_v13, %v1458_v53 }
 0x2b7   : > { %v1054_v2 = vadd.f32 %v1053_v62, %v1052_v63 }
 0x2b9   : > { %2279 = vtanh.f32 %v1054_v2  ;;  %v3081_v6 = vsel %vm1061_vm3, %v1054_v2, %v3035_v12  ;;  %v1448_v12 = vld [vmem:[#allocation12 + $0x20] sm:$0xff] }
 0x2ba   : > { %v2108_v34 = vpack.c.bf16 %v1449_v41, %v1448_v12 }
 0x2c3   : > { %v2280_v27 = vpop.eup %2279 }
 0x2c4   : > { %v1056_v28 = vmul.f32 %v2280_v27, %v2278_v8 }
 0x2c6   : > { %v3084_v22 = vsel %vm1061_vm3, %v1056_v28, %v3038_v29 }
 0x2c7   : > { %1138 = vmatmul.mubr.f32.vlgmr.msra.gmra.mrb[4].mxu0 %v3084_v22  ;;  %1209 = vmatmul.mubr.f32.vlgmr.msra.gmra.mrb[12].mxu1 %v3084_v22 }
 0x2c8   : > { %2039 = vmatpush1.bf16.msra.mxu0 %v2827_v15  ;;  %2071 = vmatpush1.bf16.msra.mxu1 %v2912_v4  ;;  %v1445_v15 = vld [vmem:[#allocation12 + $0x8] sm:$0xff] }
 0x2c9   : > { %2041 = vmatprep.subr.bf16.mxu0 %v2833_v19  ;;  %2073 = vmatprep.subr.bf16.mxu1 %v2916_v11 }
 0x2ca   : > { %1323 = vmatprep.mubr.f32.mxu0 %v2565_v9  ;;  %1394 = vmatprep.mubr.f32.mxu1 %v2565_v9  ;;  %v1444_v9 = vld [vmem:[#allocation12] sm:$0xff] }
 0x2cb   : > { %v2100_v19 = vpack.c.bf16 %v1445_v15, %v1444_v9 }
 0x2cc   : > { %2043 = vmatpush1.bf16.msra.mxu0 %v2840_v23  ;;  %2075 = vmatpush1.bf16.msra.mxu1 %v2925_v20 }
 0x2cd   : > { %2045 = vmatprep.subr.bf16.mxu0 %v2855_v32  ;;  %2077 = vmatprep.subr.bf16.mxu1 %v2930_v26 }
 0x2d0   : > { %2047 = vmatpush1.bf16.msra.mxu0 %v2861_v37  ;;  %2079 = vmatpush1.bf16.msra.mxu1 %v2940_v31 }
 0x2d1   : > { %2049 = vmatprep.subr.bf16.mxu0 %v2870_v40  ;;  %2081 = vmatprep.subr.bf16.mxu1 %v2943_v33 }
 0x2d4   : > { %2051 = vmatpush1.bf16.msra.mxu0 %v2880_v46  ;;  %2083 = vmatpush1.bf16.msra.mxu1 %v2952_v39 }
 0x2d5   : > { %2053 = vmatprep.subr.bf16.mxu0 %v2887_v50  ;;  %2085 = vmatprep.subr.bf16.mxu1 %v2956_v42 }
 0x2d8   : > { %2055 = vmatpush1.bf16.msra.mxu0 %v2896_v56  ;;  %2087 = vmatpush1.bf16.msra.mxu1 %v2964_v48 }
 0x2d9   : > { %2057 = vmatprep.subr.bf16.mxu0 %v2903_v58  ;;  %2089 = vmatprep.subr.bf16.mxu1 %v2968_v49 }
 0x2dc   : > { %2059 = vmatpush1.bf16.msra.mxu0 %v2908_v3  ;;  %2091 = vmatpush1.bf16.msra.mxu1 %v2974_v57 }
 0x2dd   : > { %2061 = vmatprep.subr.bf16.mxu0 %v2914_v5  ;;  %2093 = vmatprep.subr.bf16.mxu1 %v2978_v59  ;;  %v1446_v59 = vld [vmem:[#allocation12 + $0x10] sm:$0xff] }
 0x2e0   : > { %2063 = vmatpush1.bf16.msra.mxu0 %v2921_v18  ;;  %2095 = vmatpush1.bf16.msra.mxu1 %v2982_v0  ;;  %v1447_v0 = vld [vmem:[#allocation12 + $0x18] sm:$0xff] }
 0x2e1   : > { %2065 = vmatprep.subr.bf16.mxu0 %v2927_v21  ;;  %2097 = vmatprep.subr.bf16.mxu1 %v2986_v1 }
 0x2e4   : > { %2067 = vmatpush1.bf16.msra.mxu0 %v2934_v30  ;;  %2099 = vmatpush1.bf16.msra.mxu1 %v2990_v7  ;;  %v1246_v30 = vstv %s1245_s29 }
 0x2e5   : > { %2101 = vmatprep.subr.bf16.mxu0 %v2100_v19  ;;  %vm1247_vm4 = vcmp.eq.s32.totalorder %v1246_v30, 1 }
 0x39a   : > { %v1139_v23 = vpop.f32.mrb[4].mxu0  ;;  %v1210_v32 = vpop.f32.mrb[12].mxu1 }
 0x39b   : > { %v1215_v37 = vadd.f32 %v1139_v23, %v3026_v16  ;;  %v1141_v40 = vpop.f32.mrb[5].mxu0  ;;  %v1212_v46 = vpop.f32.mrb[13].mxu1  ;;  %v1762_v3 = vmul.f32 -1.442695, %v1210_v32  ;;  %v2104_v16 = vpack.c.bf16 %v1447_v0, %v1446_v59 }
 0x39c   : > { %v1216_v50 = vadd.f32 %v1141_v40, %v3028_v17 }
 0x39d   : > { %v1760_v56 = vmul.f32 -1.442695, %v1215_v37 }
 0x39e   : > { %v1761_v58 = vmul.f32 -1.442695, %v1216_v50 }
 0x39f   : > { %2281 = vpow2.f32 %v1760_v56 }
 0x3a0   : > { %2283 = vpow2.f32 %v1761_v58 }
 0x3a1   : > { %2285 = vpow2.f32 %v1762_v3 }
 0x3a2   : > { %2287 = vtanh.f32 %v1212_v46  ;;  %v1766_v46 = vld [vmem:[%s3247_s6] ss:$0 sm:$0xff] }
 0x3a9   : > { %v2282_v4 = vpop.eup %2281 }
 0x3aa   : > { %v2284_v5 = vpop.eup %2283  ;;  %v1228_v11 = vadd.f32 1.0, %v2282_v4 }
 0x3ab   : > { %v1229_v18 = vadd.f32 1.0, %v2284_v5  ;;  %v2286_v20 = vpop.eup %2285 }
 0x3ac   : > { %2289 = vrcp.f32 %v1228_v11  ;;  %v2288_v21 = vpop.eup %2287  ;;  %v1230_v33 = vadd.f32 1.0, %v2286_v20 }
 0x3ad   : > { %2291 = vrcp.f32 %v1229_v18 }
 0x3ae   : > { %2293 = vrcp.f32 %v1230_v33 }
 0x3b6   : > { %v2290_v26 = vpop.eup %2289 }
 0x3b7   : > { %v2292_v31 = vpop.eup %2291  ;;  %v1239_v39 = vmul.f32 %v2290_v26, %v2288_v21 }
 0x3b8   : > { %v1238_v42 = vmul.f32 %v2292_v31, %v3081_v6  ;;  %v2294_v57 = vpop.eup %2293 }
 0x3ba   : > { %v1240_v48 = vadd.f32 %v1239_v39, %v1238_v42 }
 0x3bc   : > { %2295 = vtanh.f32 %v1240_v48  ;;  %v3125_v49 = vsel %vm1247_vm4, %v1240_v48, %v3081_v6 }
 0x3c6   : > { %v2296_v1 = vpop.eup %2295 }
 0x3c7   : > { %v1242_v7 = vmul.f32 %v2296_v1, %v2294_v57 }
 0x3c9   : > { %v3128_v17 = vsel %vm1247_vm4, %v1242_v7, %v3084_v22 }
 0x3ca   : > { %1324 = vmatmul.mubr.f32.vlgmr.msra.gmra.mrb[6].mxu0 %v3128_v17  ;;  %1395 = vmatmul.mubr.f32.vlgmr.msra.gmra.mrb[14].mxu1 %v3128_v17 }
 0x3cb   : > { %2103 = vmatpush3.bf16.msra.mxu0 %v2100_v19  ;;  %1830 = vmatprep.mubr.f32.mxu0 %v3038_v29  ;;  %v2124_v29 = vpack.c.bf16 %v1457_v10, %v1456_v54 }
 0x3cc   : > { %2105 = vmatprep.subr.bf16.mxu0 %v2104_v16 }
 0x3cf   : > { %2107 = vmatpush3.bf16.msra.mxu0 %v2104_v16 }
 0x3d0   : > { %2109 = vmatprep.subr.bf16.mxu0 %v2108_v34 }
 0x3d3   : > { %2111 = vmatpush3.bf16.msra.mxu0 %v2108_v34 }
 0x3d4   : > { %2113 = vmatprep.subr.bf16.mxu0 %v2112_v38 }
 0x3d7   : > { %2115 = vmatpush3.bf16.msra.mxu0 %v2112_v38 }
 0x3d8   : > { %2117 = vmatprep.subr.bf16.mxu0 %v2116_v45 }
 0x3db   : > { %2119 = vmatpush3.bf16.msra.mxu0 %v2116_v45 }
 0x3dc   : > { %2121 = vmatprep.subr.bf16.mxu0 %v2120_v52 }
 0x3df   : > { %2123 = vmatpush3.bf16.msra.mxu0 %v2120_v52 }
 0x3e0   : > { %2125 = vmatprep.subr.bf16.mxu0 %v2124_v29 }
 0x3e3   : > { %2127 = vmatpush3.bf16.msra.mxu0 %v2124_v29 }
 0x3e4   : > { %2129 = vmatprep.subr.bf16.mxu0 %v2128_v55 }
 0x3e7   : > { %2131 = vmatpush3.bf16.msra.mxu0 %v2128_v55 }
 0x3ea   : > { %1831 = vmatmul.mubr.f32.vlgmr.msra.gmra.mrb[8].mxu0 %v3084_v22 }
 0x3eb   : > { %1833 = vmatprep.mubr.f32.mxu0 %v3128_v17 }
 0x49d   : > { %v1325_v14 = vpop.f32.mrb[6].mxu0  ;;  %v1396_v60 = vpop.f32.mrb[14].mxu1 }
 0x49e   : > { %v1401_v61 = vadd.f32 %v1325_v14, %v3030_v24  ;;  %v1327_v62 = vpop.f32.mrb[7].mxu0  ;;  %v1398_v63 = vpop.f32.mrb[15].mxu1  ;;  %v1765_v27 = vmul.f32 -1.442695, %v1396_v60 }
 0x49f   : > { %v1402_v2 = vadd.f32 %v1327_v62, %v3032_v25  ;;  %v1432_v25 = vstv %s1431_s28 }
 0x4a0   : > { %v1763_v6 = vmul.f32 -1.442695, %v1401_v61  ;;  %vm1433_vm5 = vcmp.eq.s32.totalorder %v1432_v25, 1 }
 0x4a1   : > { %v1764_v8 = vmul.f32 -1.442695, %v1402_v2 }
 0x4a2   : > { %2297 = vpow2.f32 %v1763_v6 }
 0x4a3   : > { %2299 = vpow2.f32 %v1764_v8 }
 0x4a4   : > { %2301 = vpow2.f32 %v1765_v27 }
 0x4a5   : > { %2303 = vtanh.f32 %v1398_v63 }
 0x4ac   : > { %v2298_v28 = vpop.eup %2297 }
 0x4ad   : > { %v2300_v9 = vpop.eup %2299  ;;  %v1414_v15 = vadd.f32 1.0, %v2298_v28 }
 0x4ae   : > { %v1415_v22 = vadd.f32 1.0, %v2300_v9  ;;  %v2302_v24 = vpop.eup %2301 }
 0x4af   : > { %2305 = vrcp.f32 %v1414_v15  ;;  %v2304_v19 = vpop.eup %2303  ;;  %v1416_v37 = vadd.f32 1.0, %v2302_v24 }
 0x4b0   : > { %2307 = vrcp.f32 %v1415_v22 }
 0x4b1   : > { %2309 = vrcp.f32 %v1416_v37 }
 0x4b9   : > { %v2306_v23 = vpop.eup %2305 }
 0x4ba   : > { %v2308_v32 = vpop.eup %2307  ;;  %v1425_v40 = vmul.f32 %v2306_v23, %v2304_v19 }
 0x4bb   : > { %v1424_v50 = vmul.f32 %v2308_v32, %v3125_v49  ;;  %v2310_v18 = vpop.eup %2309 }
 0x4bd   : > { %v1832_v56 = vpop.f32.mrb[8].mxu0  ;;  %v1426_v58 = vadd.f32 %v1425_v40, %v1424_v50 }
 0x4be   : > { %v1539_v3 = vadd.f32 %v1832_v56, %v1766_v46  ;;  %v1533_v4 = vpop.f32.mrb[9].mxu0 }
 0x4bf   : > { %v1534_v5 = vadd.f32 %v1766_v46, %v1533_v4  ;;  %2311 = vtanh.f32 %v1426_v58  ;;  %v1435_v11 = vsel %vm1433_vm5, %v1426_v58, %v3125_v49 }
 0x4c0   : > { %1553 = vst [vmem:[%s2804_s22 + $0x8] sm:$0xff] %v1539_v3  ;;  %1439 = vst [vmem:[#allocation5] sm:$0xff] %v1435_v11 }
 0x4c1   : > { %1552 = vst [vmem:[%s2804_s22] sm:$0xff] %v1534_v5  ;;  %1561 = vst [vmem:[#allocation17] sm:$0xff] (!%p1767_p12), %v1435_v11 }
 0x4c9   : > { %v2312_v20 = vpop.eup %2311 }
 0x4ca   : > { %v1428_v21 = vmul.f32 %v2312_v20, %v2310_v18 }
 0x4cc   : > { %v1434_v26 = vsel %vm1433_vm5, %v1428_v21, %v3128_v17 }
 0x4cd   : > { %1438 = vst [vmem:[#allocation4] sm:$0xff] %v1434_v26  ;;  %1834 = vmatmul.mubr.f32.gmra.mrb[10].mxu0 %v1434_v26  ;;  %1560 = vst [vmem:[#allocation15] sm:$0xff] (!%p1767_p12), %v1434_v26 }
 0x59e   : > { %1559 = sbr.rel (%p1767_p12) target bundleno = 1445 (0x5a5), region = 72 }
 0x5a0   : > { %v1835_v30 = vpop.f32.mrb[10].mxu0 }
 0x5a1   : > { %v1549_v31 = vadd.f32 %v1835_v30, %v1766_v46  ;;  %v1543_v33 = vpop.f32.mrb[11].mxu0 }
 0x5a2   : > { %v1544_v39 = vadd.f32 %v1766_v46, %v1543_v33 }
 0x5a3   : > { %1555 = vst [vmem:[%s2804_s22 + $0x18] sm:$0xff] %v1549_v31 }
 0x5a4   : > { %1554 = vst [vmem:[%s2804_s22 + $0x10] sm:$0xff] %v1544_v39 }
 0x5a5 PF: > { %s2566_s21 = smov [#allocation15]   ;;  %s1777_s1 = sshll.u32 %s2642_s13, 9 }
 0x5a6   : > { %s1590_s15 = sshll.u32 %s2566_s21, 4  ;;  %s3153_s14 = scalar_lea.hbm %s3248_s7, %s1777_s1  ;;  %s1591_s15 = int_to_ptr.vmem [resolvable:$true] %s1590_s15 }
 0x5a7   : > { %s2425_s16 = scalar_lea.vmem %s1591_s15, 128  ;;  %p3278_p0 = scmp.eq.s32.totalorder %s2642_s13, 1 }
 0x5a8   : > { %p2426_p2 = scmp.ne.s32.totalorder %s1591_s15, %s2425_s16  ;;  %p2432_p5 = scmp.lt.s32.totalorder %s1591_s15, %s1591_s15 }
 0x5a9   : > { %p2433_p9 = scmp.lt.s32.totalorder %s2425_s16, %s2425_s16 }
 0x5aa   : > { %p2427_p1 = pnand %p2426_p2, %p3278_p0 }
 0x5ab   : > { %p2434_p13 = por %p2433_p9, %p2432_p5 }
 0x5ac   : > { %p2428_p6 = pneg %p2427_p1 }
 0x5ae   : > { %p2435_p10 = pnand %p2434_p13, %p2428_p6 }
 0x5b0   : > { %2438 = shalt.err (!%p2435_p10)
}
 0x5b1   : > { %s2439_s27 = scalar_lea.hbm %s3249_s8, 128  ;;  %p3279_p3 = pmov %p3278_p0 }
 0x5b2   : > { %p2440_p11 = scmp.ne.s32.totalorder %s3249_s8, %s2439_s27  ;;  %p2445_p8 = scmp.lt.u32.totalorder %s2439_s27, %s3249_s8 }
 0x5b4   : > { %p2441_p4 = pnand %p2440_p11, %p3279_p3 }
 0x5b6   : > { %p2442_p7 = pneg %p2441_p4 }
 0x5b8   : > { %p2447_p12 = pnand %p2445_p8, %p2442_p7 }
 0x5ba   : > { %2450 = shalt.err (!%p2447_p12)
}
 0x5bb   : > { %p3280_p2 = pmov %p3278_p0  ;;  %s1576_s1 = sshll.u32 %s2804_s22, 4  ;;  %s3174_s1 = int_to_ptr.vmem [resolvable:$true] %s1576_s1 }
 0x5bc   : > { %s3178_s26 = scalar_lea.sflag [#allocation8], %s371_s2  ;;  %s2451_s24 = scalar_lea.vmem %s3174_s1, 512 }
 0x5bd   : > { %2166 = dma.vmem_to_hbm [thread:$0]  (%p3280_p2), %s1591_s15, 128, %s3249_s8, [#allocation16]  }
 0x5be   : > { %p2452_p0 = scmp.ne.s32.totalorder %s3174_s1, %s2451_s24  ;;  %p3281_p1 = scmp.ne.s32.totalorder %s3263_s19, 0 }
 0x5bf   : > { %s2567_s16 = smov [#allocation14]  }
 0x5c0   : > { %p2453_p6 = pnand %p2452_p0, %p3281_p1  ;;  %s2455_s17 = sshll.u32 %s2567_s16, 4  ;;  %s2456_s17 = int_to_ptr.vmem [resolvable:$false] %s2455_s17 }
 0x5c1   : > { %s2457_s18 = scalar_lea.vmem %s2456_s17, 1024  ;;  %p2458_p9 = scmp.lt.s32.totalorder %s3174_s1, %s2456_s17 }
 0x5c2   : > { %p2454_p5 = pneg %p2453_p6  ;;  %p2459_p13 = scmp.lt.s32.totalorder %s2457_s18, %s2451_s24 }
 0x5c4   : > { %p2460_p10 = por %p2459_p13, %p2458_p9 }
 0x5c6   : > { %p2461_p11 = pnand %p2460_p10, %p2454_p5 }
 0x5c8   : > { %2464 = shalt.err (!%p2461_p11)
}
 0x5c9   : > { %s2465_s2 = scalar_lea.hbm %s3153_s14, 512  ;;  %s2469_s27 = scalar_lea.hbm %s3248_s7, 1024 }
 0x5ca   : > { %p2466_p3 = scmp.ne.s32.totalorder %s3153_s14, %s2465_s2  ;;  %p2470_p8 = scmp.lt.u32.totalorder %s3153_s14, %s3248_s7 }
 0x5cb   : > { %p2471_p12 = scmp.lt.u32.totalorder %s2469_s27, %s2465_s2  ;;  %p2473_p0 = scmp.lt.u32.totalorder %s2465_s2, %s3153_s14 }
 0x5cc   : > { %p2467_p4 = pnand %p2466_p3, %p3281_p1 }
 0x5cd   : > { %p2472_p2 = por %p2471_p12, %p2470_p8 }
 0x5ce   : > { %p2468_p7 = pneg %p2467_p4 }
 0x5cf   : > { %p2474_p6 = por %p2473_p0, %p2472_p2 }
 0x5d1   : > { %p2475_p5 = pnand %p2474_p6, %p2468_p7 }
 0x5d3   : > { %2478 = shalt.err (!%p2475_p5)
}
 0x5d4   : > { %s2568_s28 = smov 128   ;;  %s2569_s23 = smov 8  }
 0x5d5   : > { %2164 = dma.vmem_to_hbm [thread:$0]  (%p3281_p1), %s3174_s1, 512, %s3153_s14, %s3178_s26, %s2568_s28, %s2568_s28, %s2569_s23  }
 0x5d6   : > { %s2570_s11 = smov [#allocation17]   ;;  %p3282_p13 = scmp.eq.s32.totalorder %s2642_s13, 1 }
 0x5d7   : > { %s1601_s21 = sshll.u32 %s2570_s11, 4  ;;  %s1602_s21 = int_to_ptr.vmem [resolvable:$true] %s1601_s21 }
 0x5d8   : > { %s2479_s24 = scalar_lea.vmem %s1602_s21, 128  ;;  %p2486_p3 = scmp.lt.s32.totalorder %s1602_s21, %s1602_s21 }
 0x5d9   : > { %p2480_p9 = scmp.ne.s32.totalorder %s1602_s21, %s2479_s24  ;;  %p2487_p4 = scmp.lt.s32.totalorder %s2479_s24, %s2479_s24 }
 0x5db   : > { %p2481_p10 = pnand %p2480_p9, %p3282_p13  ;;  %p2488_p7 = por %p2487_p4, %p2486_p3 }
 0x5dd   : > { %p2482_p11 = pneg %p2481_p10 }
 0x5df   : > { %p2489_p8 = pnand %p2488_p7, %p2482_p11 }
 0x5e1   : > { %2492 = shalt.err (!%p2489_p8)
}
 0x5e2   : > { %s2493_s18 = scalar_lea.hbm %s3250_s9, 128  ;;  %p3283_p12 = pmov %p3282_p13 }
 0x5e3   : > { %p2494_p1 = scmp.ne.s32.totalorder %s3250_s9, %s2493_s18  ;;  %p2499_p6 = scmp.lt.u32.totalorder %s2493_s18, %s3250_s9 }
 0x5e5   : > { %p2495_p2 = pnand %p2494_p1, %p3283_p12 }
 0x5e7   : > { %p2496_p0 = pneg %p2495_p2 }
 0x5e9   : > { %p2501_p5 = pnand %p2499_p6, %p2496_p0 }
 0x5eb   : > { %2504 = shalt.err (!%p2501_p5)
}
 0x5ec   : > { %p3284_p9 = pmov %p3283_p12 }
 0x5ee   : > { %2168 = dma.vmem_to_hbm [thread:$0]  (%p3284_p9), %s1602_s21, 128, %s3250_s9, [#allocation16]  }
 0x5ef   : > { %p3285_p13 = pmov %p3284_p9 }
 0x5f0   : > { %p3286_p10 = pmov %p3284_p9 }
 0x5f1   : > { %2534 = dma.done.wait (%p3285_p13), [#allocation16], 256  }
 0x5f2   : > { %2536 = vsyncadd (%p3286_p10), [#allocation16], 4294967040 }
 0x5f3 PF: > { %p2203_p11 = scmp.ge.s32.totalorder %s2555_s12, 2  ;;  %s1621_s15 = sand.u32 1, %s2543_s30  }
 0x5f4   : > { %p3287_p3 = scmp.ne.s32.totalorder %s3264_s20, 0  ;;  %s1622_s27 = scalar_lea.sflag [#allocation8], %s1621_s15 }
 0x5f6   : > { %p2188_p4 = pnand %p2203_p11, %p3287_p3 }
 0x5f8   : > { %2538 = dma.done.wait (!%p2188_p4), %s1622_s27, 512  }
 0x5f9   : > { %2540 = vsyncadd (!%p2188_p4), %s1622_s27, 4294966784  ;;  %s3288_s12 = sld [smem:[#allocation24_spill]]  ;;  %s3289_s29 = sld [smem:[#allocation23_spill]] }
 0x5fa   : > { %s3290_s11 = sld [smem:[#allocation25_spill]]  ;;  %s3291_s30 = smov %s2547_s10 }
 0x5ff   : > { %p24_p7 = scmp.ge.s32.totalorder %s3288_s12, 4   ;;  %s3292_s10 = smov %s3289_s29 }
 0x601   :  { %26 = sbr.rel (!%p24_p7) target bundleno = 10 (0xa), region = 131 }
 0x608   :  { %1627 = vsyncpa [#allocation7], 1 }
 0x609   :  { %1629 = vsyncpa [#allocation7 + $0x1], 1 }
 0x60a   :  { %1630 = vsyncpa [#allocation10], 1 }
 0x60b   :  { %1631 = vsyncpa [#allocation13], 1 }
 0x60c   :  { %1632 = vsyncpa [#allocation8], 1 }
 0x60d   :  { %1634 = vsyncpa [#allocation8 + $0x1], 1 }
 0x60e   :  { %1635 = vsyncpa [#allocation16], 1 }

</bundles_post_ra>
